<compile_context>
chip_gen: v7x
topology: tpu7x:2x2x1
jax: 0.10.0
libtpu: 0.0.40
codegen_flags: <defaults>
</compile_context>

<pallas_src>
import functools

import jax
import jax.numpy as jnp
from jax.experimental import pallas as pl
from jax.experimental.pallas import tpu as pltpu


def _llama_hidden_dim(dim: int, multiple_of: int, ffn_dim_multiplier=None) -> int:
    hidden_dim = 4 * dim
    hidden_dim = int(2 * hidden_dim / 3)
    if ffn_dim_multiplier is not None:
        hidden_dim = int(ffn_dim_multiplier * hidden_dim)
    hidden_dim = multiple_of * ((hidden_dim + multiple_of - 1) // multiple_of)
    return hidden_dim


def _round_up(a: int, b: int) -> int:
    return (a + b - 1) // b * b


def _tpu_vmem_capacity_bytes() -> int:
    """Physical VMEM capacity (generation-aware); conservative fallback."""
    try:
        info = pltpu.get_tpu_info()
        cap = getattr(info, "vmem_capacity_bytes", None)
        if cap:
            return int(cap)
    except Exception:
        pass
    return 64 * 1024 * 1024  # v7x-sized fallback (safe everywhere)


def _vmem_estimate(tm: int, th: int, D: int, x_sz: int, c_sz: int, o_sz: int) -> int:
    """Double-buffered streams + f32 accumulator footprint for one grid step."""
    return (2 * D * 2 * th * c_sz      # fused w1|w3 tile (double-buffered)
            + 2 * th * D * c_sz        # w2 tile (double-buffered)
            + 2 * tm * D * x_sz        # x token tile, native dtype (double-buffered)
            + 2 * tm * D * o_sz        # output tile (double-buffered)
            + tm * D * 4)              # f32 accumulator scratch


# ----------------------------------------------------------------------------
# One-time weight packing (run OUTSIDE the per-call path).
# ----------------------------------------------------------------------------
def pack_ffn_weights(w1_t, w3_t, w2_t, *, tile_h=1024, compute_dtype=None):
    """Pack LLaMA FFN weights once.

    w1_t / w3_t: (D, H) transposed nn.Linear weights; w2_t: (H, D).
    Returns (w13, w2p, th):
      w13 (D, 2*H_pad): per hidden tile of width th, columns are [w1 tile | w3 tile];
      w2p (H_pad, D);  H is zero-padded so H_pad % th == 0 (padding contributes 0).
    compute_dtype: dtype weights are streamed in (bf16 recommended on v6e/v7x);
    defaults to the weights' dtype. MXU accumulation is f32 regardless.
    """
    D, H = w1_t.shape
    assert w3_t.shape == (D, H) and w2_t.shape == (H, D)
    cdt = jnp.dtype(compute_dtype) if compute_dtype is not None else jnp.dtype(w1_t.dtype)

    th = min(int(tile_h), _round_up(H, 128))
    th = _round_up(th, 128)
    H_pad = _round_up(H, th)
    if H_pad != H:
        w1_t = jnp.pad(w1_t, ((0, 0), (0, H_pad - H)))
        w3_t = jnp.pad(w3_t, ((0, 0), (0, H_pad - H)))
        w2_t = jnp.pad(w2_t, ((0, H_pad - H), (0, 0)))
    n_h = H_pad // th
    w13 = jnp.concatenate(
        [w1_t.reshape(D, n_h, th), w3_t.reshape(D, n_h, th)], axis=-1
    ).reshape(D, 2 * H_pad).astype(cdt)
    w2p = w2_t.astype(cdt)
    return w13, w2p, th


# ----------------------------------------------------------------------------
# Kernel
# ----------------------------------------------------------------------------
def ffn_kernel(x_ref, w13_ref, w2_ref, o_ref, acc_ref, *, tile_h):
    """Grid step (i, j): token tile i, hidden tile j (reduction axis).

    h13 = x_tile @ w13_tile            (tm, 2*th)   fused w1|w3 matmul
    h   = silu(h13[:, :th]) * h13[:, th:]
    acc += h @ w2_tile                 (tm, D)      f32 accumulation
    """
    j = pl.program_id(1)

    @pl.when(j == 0)
    def _():
        acc_ref[...] = jnp.zeros_like(acc_ref)

    # Cast x in-kernel (cheap VPU op, hidden under DMA) — avoids a wrapper-side
    # O(M*D) materialization pass over the activations.
    x = x_ref[...].astype(w13_ref.dtype)
    h13 = jnp.dot(x, w13_ref[...], preferred_element_type=jnp.float32)
    h1 = h13[:, :tile_h]
    h3 = h13[:, tile_h:]
    h = (h1 * jax.nn.sigmoid(h1)) * h3                      # silu(h1) * h3
    acc_ref[...] += jnp.dot(h.astype(w2_ref.dtype), w2_ref[...],
                            preferred_element_type=jnp.float32)

    @pl.when(j == pl.num_programs(1) - 1)
    def _():
        o_ref[...] = acc_ref[...].astype(o_ref.dtype)


# ----------------------------------------------------------------------------
# Jitted pallas_call wrapper (tiles are static)
# ----------------------------------------------------------------------------
@functools.partial(jax.jit, static_argnames=("tm", "th", "vmem_limit"))
def _ffn_call(x, w13, w2p, *, tm, th, vmem_limit):
    B, S, D = x.shape
    H_pad = w2p.shape[0]
    n_h = H_pad // th

    M = B * S
    M_pad = _round_up(M, tm)
    x2d = x.reshape(M, D)
    if M_pad != M:
        x2d = jnp.pad(x2d, ((0, M_pad - M), (0, 0)))        # zero rows -> zero output rows
    n_tok = M_pad // tm

    x_sz = jnp.dtype(x.dtype).itemsize
    c_sz = jnp.dtype(w13.dtype).itemsize
    flops = 6 * M_pad * D * H_pad                            # 2*M*D*2H + 2*M*H*D
    transcendentals = M_pad * H_pad                          # sigmoid
    bytes_accessed = (M_pad * D * x_sz                       # activations in
                      + n_tok * 3 * D * H_pad * c_sz         # weights re-streamed per token tile
                      + M_pad * D * x_sz)                    # activations out

    out2d = pl.pallas_call(
        functools.partial(ffn_kernel, tile_h=th),
        out_shape=jax.ShapeDtypeStruct((M_pad, D), x.dtype),
        grid_spec=pltpu.PrefetchScalarGridSpec(
            num_scalar_prefetch=0,
            grid=(n_tok, n_h),
            in_specs=[
                pl.BlockSpec((tm, D), lambda i, j: (i, 0)),        # x token tile
                pl.BlockSpec((D, 2 * th), lambda i, j: (0, j)),    # fused w1|w3 tile
                pl.BlockSpec((th, D), lambda i, j: (j, 0)),        # w2 tile
            ],
            out_specs=pl.BlockSpec((tm, D), lambda i, j: (i, 0)),  # accumulator output
            scratch_shapes=[pltpu.VMEM((tm, D), jnp.float32)],
        ),
        compiler_params=pltpu.CompilerParams(
            dimension_semantics=("parallel", "arbitrary"),
            vmem_limit_bytes=vmem_limit,
        ),
        cost_estimate=pl.CostEstimate(flops=flops,
                                      transcendentals=transcendentals,
                                      bytes_accessed=bytes_accessed),
    )(x2d, w13, w2p)

    if M_pad != M:
        out2d = out2d[:M]
    return out2d.reshape(B, S, D)


def feed_forward(x, w13, w2p, *, tile_h, tile_m=512):
    """x: (B, S, D); (w13, w2p, tile_h) from pack_ffn_weights. Returns (B, S, D) in x.dtype."""
    B, S, D = x.shape
    H_pad = w2p.shape[0]
    assert w13.shape == (D, 2 * H_pad) and w2p.shape == (H_pad, D)
    assert H_pad % tile_h == 0 and tile_h % 128 == 0
    M = B * S

    x_sz = jnp.dtype(x.dtype).itemsize
    c_sz = jnp.dtype(w13.dtype).itemsize
    o_sz = x_sz
    # dtype-correct sublane multiple: 8 (f32) / 16 (bf16) / 32 (int8/fp8)
    sublane = max(8, 32 // min(x_sz, c_sz))

    tm = min(int(tile_m), _round_up(M, sublane))
    tm = _round_up(tm, sublane)

    cap = _tpu_vmem_capacity_bytes()
    budget = int(cap * 0.85)                                 # headroom for compiler scratch
    while tm > sublane and _vmem_estimate(tm, tile_h, D, x_sz, c_sz, o_sz) > budget:
        tm = max(sublane, _round_up(tm // 2, sublane))
    est = _vmem_estimate(tm, tile_h, D, x_sz, c_sz, o_sz)
    vmem_limit = int(min(max(est + est // 4, 32 * 1024 * 1024), int(cap * 0.9)))

    # TODO(synk): v7x decode (single token tile): split the hidden reduction over the
    # two TensorCores (leading size-2 parallel axis + trailing XLA add) to use both TCs.
    # TODO(synk): int8 (v5e/v6e) / fp8 (v7x) weight path with per-tile dequant scales.
    return _ffn_call(x, w13, w2p, tm=tm, th=int(tile_h), vmem_limit=vmem_limit)


# ----------------------------------------------------------------------------
# Pure-JAX reference (mirrors the PyTorch forward and the kernel's dtypes)
# ----------------------------------------------------------------------------
def feed_forward_ref(x, w1_t, w3_t, w2_t, compute_dtype=None):
    cdt = jnp.dtype(compute_dtype) if compute_dtype is not None else jnp.dtype(w1_t.dtype)
    xc = x.astype(cdt)
    h1 = jnp.einsum("bsd,dh->bsh", xc, w1_t.astype(cdt),
                    preferred_element_type=jnp.float32)
    h3 = jnp.einsum("bsd,dh->bsh", xc, w3_t.astype(cdt),
                    preferred_element_type=jnp.float32)
    h = (h1 * jax.nn.sigmoid(h1)) * h3
    out = jnp.einsum("bsh,hd->bsd", h.astype(cdt), w2_t.astype(cdt),
                     preferred_element_type=jnp.float32)
    return out.astype(x.dtype)


if __name__ == "__main__":
    # Small config consistent with ModelArgs semantics (multiple_of default = 256).
    dim = 256
    multiple_of = 256
    hidden = _llama_hidden_dim(dim, multiple_of)   # 4*256=1024 -> 682 -> 768
    batch, seq = 2, 8

    key = jax.random.PRNGKey(0)
    kx, k1, k2, k3 = jax.random.split(key, 4)

    x = jax.random.normal(kx, (batch, seq, dim), dtype=jnp.float32)
    # nn.Linear(dim, hidden).weight has shape (hidden, dim); store transposed.
    w1_t = (jax.random.normal(k1, (dim, hidden), dtype=jnp.float32)
            / jnp.sqrt(jnp.float32(dim)))
    w3_t = (jax.random.normal(k3, (dim, hidden), dtype=jnp.float32)
            / jnp.sqrt(jnp.float32(dim)))
    w2_t = (jax.random.normal(k2, (hidden, dim), dtype=jnp.float32)
            / jnp.sqrt(jnp.float32(hidden)))

    # 1) f32 path (pack once, call).
    w13_f32, w2p_f32, th_f32 = pack_ffn_weights(w1_t, w3_t, w2_t)
    out = jax.block_until_ready(feed_forward(x, w13_f32, w2p_f32, tile_h=th_f32))
    ref = feed_forward_ref(x, w1_t, w3_t, w2_t)
    assert out.shape == (batch, seq, dim)
    assert jnp.allclose(out, ref, atol=2e-3, rtol=2e-3), float(
        jnp.max(jnp.abs(out - ref)))

    # 2) bf16-streamed path (weight-bandwidth-bound regime); f32 accumulation inside.
    w13_bf, w2p_bf, th_bf = pack_ffn_weights(w1_t, w3_t, w2_t,
                                             compute_dtype="bfloat16")
    out_bf = jax.block_until_ready(feed_forward(x, w13_bf, w2p_bf, tile_h=th_bf))
    ref_bf = feed_forward_ref(x, w1_t, w3_t, w2_t, compute_dtype="bfloat16")
    assert jnp.allclose(out_bf, ref_bf, atol=3e-2, rtol=3e-2), float(
        jnp.max(jnp.abs(out_bf - ref_bf)))

    # 3) Exercise H-padding (th=512 -> H_pad=1024) and ragged-M padding (seq=11).
    x_odd = jax.random.normal(kx, (batch, 11, dim), dtype=jnp.float32)
    w13_p, w2p_p, th_p = pack_ffn_weights(w1_t, w3_t, w2_t, tile_h=512)
    out_p = jax.block_until_ready(feed_forward(x_odd, w13_p, w2p_p, tile_h=th_p))
    ref_p = feed_forward_ref(x_odd, w1_t, w3_t, w2_t)
    assert out_p.shape == (batch, 11, dim)
    assert jnp.allclose(out_p, ref_p, atol=2e-3, rtol=2e-3), float(
        jnp.max(jnp.abs(out_p - ref_p)))

    print("KERNEL_OK")
</pallas_src>

<mosaic_0001>
module attributes {stable_mosaic.version = 11 : i64} {
  func.func @ffn_kernel(%arg0: i32, %arg1: i32, %arg2: memref<16x256xf32, #tpu.memory_space<vmem>>, %arg3: memref<256x1536xf32, #tpu.memory_space<vmem>>, %arg4: memref<768x256xf32, #tpu.memory_space<vmem>>, %arg5: memref<16x256xf32, #tpu.memory_space<vmem>>, %arg6: memref<16x256xf32, #tpu.memory_space<vmem>>) attributes {dimension_semantics = [#tpu.dimension_semantics<parallel>, #tpu.dimension_semantics<arbitrary>], iteration_bounds = array<i64: 1, 1>, scalar_prefetch = 0 : i64, scratch_operands = 1 : i64, tpu.core_type = #tpu.core_type<tc>, window_params = [{transform_indices = @transform_0, window_bounds = array<i64: 16, 256>}, {transform_indices = @transform_1, window_bounds = array<i64: 256, 1536>}, {transform_indices = @transform_2, window_bounds = array<i64: 768, 256>}, {transform_indices = @transform_3, window_bounds = array<i64: 16, 256>}]} {
    %c0_i32 = arith.constant 0 : i32
    %0 = arith.cmpi eq, %arg1, %c0_i32 : i32
    %1 = arith.extui %0 : i1 to i32
    %c0_i32_0 = arith.constant 0 : i32
    %2 = arith.cmpi ne, %1, %c0_i32_0 : i32
    scf.if %2 {
      %cst_14 = arith.constant 0.000000e+00 : f32
      %23 = vector.broadcast %cst_14 : f32 to vector<16x256xf32>
      %c0_15 = arith.constant 0 : index
      %c0_16 = arith.constant 0 : index
      %24 = vector.load %arg6[%c0_15, %c0_16] : memref<16x256xf32, #tpu.memory_space<vmem>>, vector<16x256xf32>
      tpu.vector_store %arg6[%c0_15, %c0_16], %23 {strides = array<i32>} : memref<16x256xf32, #tpu.memory_space<vmem>>, vector<16x256xf32>,
    } else {
    }
    %c0 = arith.constant 0 : index
    %c0_1 = arith.constant 0 : index
    %3 = vector.load %arg2[%c0, %c0_1] : memref<16x256xf32, #tpu.memory_space<vmem>>, vector<16x256xf32>
    %c0_2 = arith.constant 0 : index
    %c0_3 = arith.constant 0 : index
    %4 = vector.load %arg3[%c0_2, %c0_3] : memref<256x1536xf32, #tpu.memory_space<vmem>>, vector<256x1536xf32>
    %cst = arith.constant dense<0.000000e+00> : vector<16x1536xf32>
    %5 = tpu.matmul %3, %4, %cst {dimension_numbers = #tpu.dot_dimension_numbers<[1], [0], [0], [1], [0, 0, 1, 1], [], []>} : vector<16x256xf32>, vector<256x1536xf32>, vector<16x1536xf32> -> vector<16x1536xf32>
    %6 = vector.extract_strided_slice %5 {offsets = [0, 0], sizes = [16, 768], strides = [1, 1]} : vector<16x1536xf32> to vector<16x768xf32>
    %7 = vector.extract_strided_slice %5 {offsets = [0, 768], sizes = [16, 768], strides = [1, 1]} : vector<16x1536xf32> to vector<16x768xf32>
    %8 = arith.negf %6 : vector<16x768xf32>
    %9 = math.exp %8 : vector<16x768xf32>
    %cst_4 = arith.constant 1.000000e+00 : f32
    %10 = vector.broadcast %cst_4 : f32 to vector<16x768xf32>
    %11 = arith.addf %10, %9 : vector<16x768xf32>
    %12 = arith.divf %10, %11 : vector<16x768xf32>
    %13 = arith.mulf %6, %12 : vector<16x768xf32>
    %14 = arith.mulf %13, %7 : vector<16x768xf32>
    %c0_5 = arith.constant 0 : index
    %c0_6 = arith.constant 0 : index
    %15 = vector.load %arg6[%c0_5, %c0_6] : memref<16x256xf32, #tpu.memory_space<vmem>>, vector<16x256xf32>
    %c0_7 = arith.constant 0 : index
    %c0_8 = arith.constant 0 : index
    %16 = vector.load %arg4[%c0_7, %c0_8] : memref<768x256xf32, #tpu.memory_space<vmem>>, vector<768x256xf32>
    %cst_9 = arith.constant dense<0.000000e+00> : vector<16x256xf32>
    %17 = tpu.matmul %14, %16, %cst_9 {dimension_numbers = #tpu.dot_dimension_numbers<[1], [0], [0], [1], [0, 0, 1, 1], [], []>} : vector<16x768xf32>, vector<768x256xf32>, vector<16x256xf32> -> vector<16x256xf32>
    %18 = arith.addf %15, %17 : vector<16x256xf32>
    %c0_10 = arith.constant 0 : index
    %c0_11 = arith.constant 0 : index
    %19 = vector.load %arg6[%c0_10, %c0_11] : memref<16x256xf32, #tpu.memory_space<vmem>>, vector<16x256xf32>
    tpu.vector_store %arg6[%c0_10, %c0_11], %18 {strides = array<i32>} : memref<16x256xf32, #tpu.memory_space<vmem>>, vector<16x256xf32>,
    %c0_i32_12 = arith.constant 0 : i32
    %20 = arith.cmpi eq, %arg1, %c0_i32_12 : i32
    %21 = arith.extui %20 : i1 to i32
    %c0_i32_13 = arith.constant 0 : i32
    %22 = arith.cmpi ne, %21, %c0_i32_13 : i32
    scf.if %22 {
      %c0_14 = arith.constant 0 : index
      %c0_15 = arith.constant 0 : index
      %23 = vector.load %arg6[%c0_14, %c0_15] : memref<16x256xf32, #tpu.memory_space<vmem>>, vector<16x256xf32>
      %c0_16 = arith.constant 0 : index
      %c0_17 = arith.constant 0 : index
      %24 = vector.load %arg5[%c0_16, %c0_17] : memref<16x256xf32, #tpu.memory_space<vmem>>, vector<16x256xf32>
      tpu.vector_store %arg5[%c0_16, %c0_17], %23 {strides = array<i32>} : memref<16x256xf32, #tpu.memory_space<vmem>>, vector<16x256xf32>,
    } else {
    }
    return
  }
  func.func @transform_0(%arg0: i32, %arg1: i32) -> (i32, i32) {
    %c0_i32 = arith.constant 0 : i32
    %c0_i32_0 = arith.constant 0 : i32
    return %arg0, %c0_i32 : i32, i32
  }
  func.func @transform_1(%arg0: i32, %arg1: i32) -> (i32, i32) {
    %c0_i32 = arith.constant 0 : i32
    %c0_i32_0 = arith.constant 0 : i32
    return %c0_i32, %arg1 : i32, i32
  }
  func.func @transform_2(%arg0: i32, %arg1: i32) -> (i32, i32) {
    %c0_i32 = arith.constant 0 : i32
    %c0_i32_0 = arith.constant 0 : i32
    return %arg1, %c0_i32 : i32, i32
  }
  func.func @transform_3(%arg0: i32, %arg1: i32) -> (i32, i32) {
    %c0_i32 = arith.constant 0 : i32
    %c0_i32_0 = arith.constant 0 : i32
    return %arg0, %c0_i32 : i32, i32
  }
}

</mosaic_0001>

<bundles_post_ra>
// kernel: _ffn_call.1
= control target key start
LH: loop header
LB: loop body
LE: loop exit
PB: predicated region body
PF: predicated region fallthrough
CT: control target
= control target key end

     0   :  { %8 = vsyncpa [#allocation4], 0  ;;  %s2538_s0 = inlined_call_operand.hbm [shape: f32[16,256], index: 0, kind: input, shape index: {}]   ;;  %s2539_s1 = inlined_call_operand.hbm [shape: f32[256,1536], index: 1, kind: input, shape index: {}]   ;;  %s2540_s2 = inlined_call_operand.hbm [shape: f32[768,256], index: 2, kind: input, shape index: {}]   ;;  %s2541_s3 = inlined_call_operand.hbm [shape: f32[16,256], index: 3, kind: output, shape index: {}]  }
   0x1   :  { %9 = vsyncpa [#allocation7], 0 }
   0x2   :  { %10 = vsyncpa [#allocation5], 0  ;;  %s2256_s12 = smov [#allocation6]   ;;  %s2162_s16 = scalar_lea.hbm %s2539_s1, 49152 }
   0x3   :  { %s28_s13 = sshll.u32 %s2256_s12, 4  ;;  %p2163_p0 = scmp.ne.s32.totalorder %s2539_s1, %s2162_s16  ;;  %s29_s13 = int_to_ptr.vmem [resolvable:$true] %s28_s13 }
   0x4   :  { %p2166_p1 = scmp.lt.u32.totalorder %s2162_s16, %s2539_s1 }
   0x6   :  { %p2168_p2 = pnand %p2166_p1, %p2163_p0 }
   0x8   :  { %2171 = shalt.err (!%p2168_p2)
}
   0x9   :  { %s2172_s21 = scalar_lea.vmem %s29_s13, 49152  ;;  %p2177_p4 = scmp.lt.s32.totalorder %s29_s13, %s29_s13 }
   0xa   :  { %p2173_p3 = scmp.ne.s32.totalorder %s29_s13, %s2172_s21  ;;  %p2178_p5 = scmp.lt.s32.totalorder %s2172_s21, %s2172_s21 }
   0xc   :  { %p2179_p6 = por %p2178_p5, %p2177_p4 }
   0xe   :  { %p2180_p7 = pnand %p2179_p6, %p2173_p3 }
  0x10   :  { %2183 = shalt.err (!%p2180_p7)
}
  0x11   :  { %s2257_s22 = smov 1536   ;;  %s2258_s23 = smov 96  }
  0x12   :  { %34 = dma.hbm_to_vmem [thread:$0]  %s2539_s1, 49152, %s29_s13, [#allocation7], %s2257_s22, %s2257_s22, %s2258_s23  }
  0x13   :  { %s2259_s26 = smov [#allocation3]   ;;  %s2184_s30 = scalar_lea.hbm %s2538_s0, 512 }
  0x14   :  { %s16_s27 = sshll.u32 %s2259_s26, 4  ;;  %p2185_p8 = scmp.ne.s32.totalorder %s2538_s0, %s2184_s30  ;;  %s17_s27 = int_to_ptr.vmem [resolvable:$true] %s16_s27 }
  0x15   :  { %p2188_p9 = scmp.lt.u32.totalorder %s2184_s30, %s2538_s0 }
  0x17   :  { %p2190_p10 = pnand %p2188_p9, %p2185_p8 }
  0x19   :  { %2193 = shalt.err (!%p2190_p10)
}
  0x1a   :  { %s2194_s8 = scalar_lea.vmem %s17_s27, 512  ;;  %p2199_p12 = scmp.lt.s32.totalorder %s17_s27, %s17_s27 }
  0x1b   :  { %p2195_p11 = scmp.ne.s32.totalorder %s17_s27, %s2194_s8  ;;  %p2200_p13 = scmp.lt.s32.totalorder %s2194_s8, %s2194_s8 }
  0x1d   :  { %p2201_p0 = por %p2200_p13, %p2199_p12 }
  0x1f   :  { %p2202_p1 = pnand %p2201_p0, %p2195_p11 }
  0x21   :  { %2205 = shalt.err (!%p2202_p1)
}
  0x22   :  { %s2260_s1 = smov 256   ;;  %s2261_s9 = smov 16  }
  0x23   :  { %22 = dma.hbm_to_vmem [thread:$0]  %s2538_s0, 512, %s17_s27, [#allocation4], %s2260_s1, %s2260_s1, %s2261_s9  }
  0x24   :  { %s2262_s12 = smov [#allocation8]   ;;  %s2206_s16 = scalar_lea.hbm %s2540_s2, 24576 }
  0x25   :  { %s40_s13 = sshll.u32 %s2262_s12, 4  ;;  %p2207_p2 = scmp.ne.s32.totalorder %s2540_s2, %s2206_s16  ;;  %s41_s13 = int_to_ptr.vmem [resolvable:$true] %s40_s13 }
  0x26   :  { %p2210_p3 = scmp.lt.u32.totalorder %s2206_s16, %s2540_s2 }
  0x28   :  { %p2212_p4 = pnand %p2210_p3, %p2207_p2 }
  0x2a   :  { %2215 = shalt.err (!%p2212_p4)
}
  0x2b   :  { %s2216_s21 = scalar_lea.vmem %s41_s13, 24576  ;;  %p2221_p6 = scmp.lt.s32.totalorder %s41_s13, %s41_s13 }
  0x2c   :  { %p2217_p5 = scmp.ne.s32.totalorder %s41_s13, %s2216_s21  ;;  %p2222_p7 = scmp.lt.s32.totalorder %s2216_s21, %s2216_s21 }
  0x2e   :  { %p2223_p8 = por %p2222_p7, %p2221_p6 }
  0x30   :  { %p2224_p9 = pnand %p2223_p8, %p2217_p5 }
  0x32   :  { %2227 = shalt.err (!%p2224_p9)
}
  0x33   :  { %46 = dma.hbm_to_vmem [thread:$0]  %s2540_s2, 24576, %s41_s13, [#allocation7], %s2260_s1, %s2260_s1, %s2261_s9  }
  0x34   :  { %2250 = dma.done.wait [#allocation4], 512  }
  0x35   :  { %2251 = vsyncadd [#allocation4], 4294966784 }
  0x36   :  { %2252 = dma.done.wait [#allocation7], 73728  }
  0x37   :  { %2253 = vsyncadd [#allocation7], 4294893568  ;;  %v69_v0 = vld [vmem:[#allocation6 + $0x8] sm:$0xff]  ;;  %v68_v2 = vld [vmem:[#allocation6] sm:$0xff]  ;;  %s2263_s2 = smov [#allocation9]  }
  0x38   :  { %v81_v1 = vld [vmem:[#allocation6 + $0x68] sm:$0xff]  ;;  %v80_v4 = vld [vmem:[#allocation6 + $0x60] sm:$0xff]  ;;  %s1461_s23 = sshll.u32 %s2263_s2, 4  ;;  %s1462_s23 = int_to_ptr.vmem [resolvable:$true] %s1461_s23 }
  0x39   :  { %v1486_v3 = vpack.c.bf16 %v81_v1, %v69_v0  ;;  %v93_v5 = vld [vmem:[#allocation6 + $0xc8] sm:$0xff]  ;;  %v1488_v7 = vpack.c.bf16 %v80_v4, %v68_v2  ;;  %v92_v9 = vld [vmem:[#allocation6 + $0xc0] sm:$0xff]  ;;  %s2228_s24 = scalar_lea.vmem %s1462_s23, 512  ;;  %p2233_p11 = scmp.lt.s32.totalorder %s1462_s23, %s1462_s23 }
  0x3a   :  { %v105_v6 = vld [vmem:[#allocation6 + $0x128] sm:$0xff]  ;;  %v104_v10 = vld [vmem:[#allocation6 + $0x120] sm:$0xff]  ;;  %p2229_p10 = scmp.ne.s32.totalorder %s1462_s23, %s2228_s24  ;;  %p2234_p12 = scmp.lt.s32.totalorder %s2228_s24, %s2228_s24 }
  0x3b   :  { %v1490_v8 = vpack.c.bf16 %v105_v6, %v93_v5  ;;  %v117_v11 = vld [vmem:[#allocation6 + $0x188] sm:$0xff]  ;;  %1487 = vmatprep.subr.bf16.mxu1 %v1486_v3  ;;  %v1492_v13 = vpack.c.bf16 %v104_v10, %v92_v9  ;;  %v116_v15 = vld [vmem:[#allocation6 + $0x180] sm:$0xff] }
  0x3c   :  { %v129_v12 = vld [vmem:[#allocation6 + $0x1e8] sm:$0xff]  ;;  %1489 = vmatpush1.bf16.msra.mxu1 %v1488_v7  ;;  %v128_v16 = vld [vmem:[#allocation6 + $0x1e0] sm:$0xff]  ;;  %p2235_p13 = por %p2234_p12, %p2233_p11 }
  0x3d   :  { %1491 = vmatprep.subr.bf16.mxu1 %v1490_v8  ;;  %v1494_v14 = vpack.c.bf16 %v129_v12, %v117_v11  ;;  %v141_v17 = vld [vmem:[#allocation6 + $0x248] sm:$0xff]  ;;  %v1496_v19 = vpack.c.bf16 %v128_v16, %v116_v15  ;;  %v140_v21 = vld [vmem:[#allocation6 + $0x240] sm:$0xff] }
  0x3e   :  { %v153_v18 = vld [vmem:[#allocation6 + $0x2a8] sm:$0xff]  ;;  %v152_v22 = vld [vmem:[#allocation6 + $0x2a0] sm:$0xff]  ;;  %p2236_p0 = pnand %p2235_p13, %p2229_p10 }
  0x3f   :  { %v1498_v20 = vpack.c.bf16 %v153_v18, %v141_v17  ;;  %v165_v23 = vld [vmem:[#allocation6 + $0x308] sm:$0xff]  ;;  %v72_v28 = vld [vmem:[#allocation6 + $0x20] sm:$0xff]  ;;  %v1500_v30 = vpack.c.bf16 %v152_v22, %v140_v21 }
  0x40   :  { %1493 = vmatpush1.bf16.msra.mxu1 %v1492_v13  ;;  %v177_v24 = vld [vmem:[#allocation6 + $0x368] sm:$0xff]  ;;  %v84_v29 = vld [vmem:[#allocation6 + $0x80] sm:$0xff] }
  0x41   :  { %1495 = vmatprep.subr.bf16.mxu1 %v1494_v14  ;;  %v73_v25 = vld [vmem:[#allocation6 + $0x28] sm:$0xff]  ;;  %v164_v31 = vld [vmem:[#allocation6 + $0x300] sm:$0xff]  ;;  %v1616_v32 = vpack.c.bf16 %v84_v29, %v72_v28  ;;  %v1502_v34 = vpack.c.bf16 %v177_v24, %v165_v23 }
  0x42   :  { %v85_v26 = vld [vmem:[#allocation6 + $0x88] sm:$0xff]  ;;  %v176_v35 = vld [vmem:[#allocation6 + $0x360] sm:$0xff] }
  0x43   :  { %v1614_v27 = vpack.c.bf16 %v85_v26, %v73_v25  ;;  %v97_v33 = vld [vmem:[#allocation6 + $0xe8] sm:$0xff]  ;;  %v96_v40 = vld [vmem:[#allocation6 + $0xe0] sm:$0xff]  ;;  %v1504_v45 = vpack.c.bf16 %v176_v35, %v164_v31 }
  0x44   :  { %1497 = vmatpush1.bf16.msra.mxu1 %v1496_v19  ;;  %v189_v36 = vld [vmem:[#allocation6 + $0x3c8] sm:$0xff]  ;;  %v108_v41 = vld [vmem:[#allocation6 + $0x140] sm:$0xff] }
  0x45   :  { %1499 = vmatprep.subr.bf16.mxu1 %v1498_v20  ;;  %1615 = vmatprep.subr.bf16.mxu0 %v1614_v27  ;;  %v109_v37 = vld [vmem:[#allocation6 + $0x148] sm:$0xff]  ;;  %v1620_v42 = vpack.c.bf16 %v108_v41, %v96_v40  ;;  %v188_v46 = vld [vmem:[#allocation6 + $0x3c0] sm:$0xff] }
  0x46   :  { %v201_v38 = vld [vmem:[#allocation6 + $0x428] sm:$0xff]  ;;  %1617 = vmatpush1.bf16.msra.mxu0 %v1616_v32  ;;  %v1618_v39 = vpack.c.bf16 %v109_v37, %v97_v33  ;;  %v120_v48 = vld [vmem:[#allocation6 + $0x1a0] sm:$0xff] }
  0x47   :  { %v121_v43 = vld [vmem:[#allocation6 + $0x1a8] sm:$0xff]  ;;  %v1506_v49 = vpack.c.bf16 %v201_v38, %v189_v36  ;;  %v200_v50 = vld [vmem:[#allocation6 + $0x420] sm:$0xff] }
  0x48   :  { %v133_v44 = vld [vmem:[#allocation6 + $0x208] sm:$0xff]  ;;  %1501 = vmatpush1.bf16.msra.mxu1 %v1500_v30  ;;  %1619 = vmatprep.subr.bf16.mxu0 %v1618_v39  ;;  %v132_v52 = vld [vmem:[#allocation6 + $0x200] sm:$0xff]  ;;  %v1508_v60 = vpack.c.bf16 %v200_v50, %v188_v46 }
  0x49   :  { %v1622_v47 = vpack.c.bf16 %v133_v44, %v121_v43  ;;  %1503 = vmatprep.subr.bf16.mxu1 %v1502_v34  ;;  %v213_v51 = vld [vmem:[#allocation6 + $0x488] sm:$0xff]  ;;  %v1624_v54 = vpack.c.bf16 %v132_v52, %v120_v48  ;;  %v144_v58 = vld [vmem:[#allocation6 + $0x260] sm:$0xff] }
  0x4a   :  { %v225_v53 = vld [vmem:[#allocation6 + $0x4e8] sm:$0xff]  ;;  %1621 = vmatpush1.bf16.msra.mxu0 %v1620_v42  ;;  %v156_v59 = vld [vmem:[#allocation6 + $0x2c0] sm:$0xff] }
  0x4b   :  { %v145_v55 = vld [vmem:[#allocation6 + $0x268] sm:$0xff]  ;;  %1623 = vmatprep.subr.bf16.mxu0 %v1622_v47  ;;  %v1510_v62 = vpack.c.bf16 %v225_v53, %v213_v51  ;;  %v212_v63 = vld [vmem:[#allocation6 + $0x480] sm:$0xff]  ;;  %v1628_v4 = vpack.c.bf16 %v156_v59, %v144_v58 }
  0x4c   :  { %v157_v56 = vld [vmem:[#allocation6 + $0x2c8] sm:$0xff]  ;;  %1505 = vmatpush1.bf16.msra.mxu1 %v1504_v45  ;;  %v224_v0 = vld [vmem:[#allocation6 + $0x4e0] sm:$0xff] }
  0x4d   :  { %v1626_v57 = vpack.c.bf16 %v157_v56, %v145_v55  ;;  %v169_v61 = vld [vmem:[#allocation6 + $0x328] sm:$0xff]  ;;  %1507 = vmatprep.subr.bf16.mxu1 %v1506_v49  ;;  %v168_v6 = vld [vmem:[#allocation6 + $0x320] sm:$0xff]  ;;  %v1512_v8 = vpack.c.bf16 %v224_v0, %v212_v63 }
  0x4e   :  { %v181_v1 = vld [vmem:[#allocation6 + $0x388] sm:$0xff]  ;;  %1625 = vmatpush1.bf16.msra.mxu0 %v1624_v54  ;;  %v180_v7 = vld [vmem:[#allocation6 + $0x380] sm:$0xff] }
  0x4f   :  { %v237_v2 = vld [vmem:[#allocation6 + $0x548] sm:$0xff]  ;;  %1627 = vmatprep.subr.bf16.mxu0 %v1626_v57  ;;  %v1630_v5 = vpack.c.bf16 %v181_v1, %v169_v61  ;;  %v236_v12 = vld [vmem:[#allocation6 + $0x540] sm:$0xff]  ;;  %v1632_v16 = vpack.c.bf16 %v180_v7, %v168_v6 }
  0x50   :  { %v249_v3 = vld [vmem:[#allocation6 + $0x5a8] sm:$0xff]  ;;  %1509 = vmatpush1.bf16.msra.mxu1 %v1508_v60  ;;  %v248_v13 = vld [vmem:[#allocation6 + $0x5a0] sm:$0xff] }
  0x51   :  { %v193_v9 = vld [vmem:[#allocation6 + $0x3e8] sm:$0xff]  ;;  %1511 = vmatprep.subr.bf16.mxu1 %v1510_v62  ;;  %v1514_v11 = vpack.c.bf16 %v249_v3, %v237_v2  ;;  %v192_v18 = vld [vmem:[#allocation6 + $0x3e0] sm:$0xff]  ;;  %v1516_v20 = vpack.c.bf16 %v248_v13, %v236_v12 }
  0x52   :  { %v205_v10 = vld [vmem:[#allocation6 + $0x448] sm:$0xff]  ;;  %1629 = vmatpush1.bf16.msra.mxu0 %v1628_v4  ;;  %v204_v19 = vld [vmem:[#allocation6 + $0x440] sm:$0xff] }
  0x53   :  { %v261_v14 = vld [vmem:[#allocation6 + $0x608] sm:$0xff]  ;;  %1631 = vmatprep.subr.bf16.mxu0 %v1630_v5  ;;  %v1634_v17 = vpack.c.bf16 %v205_v10, %v193_v9  ;;  %v260_v24 = vld [vmem:[#allocation6 + $0x600] sm:$0xff]  ;;  %v1636_v28 = vpack.c.bf16 %v204_v19, %v192_v18 }
  0x54   :  { %v273_v15 = vld [vmem:[#allocation6 + $0x668] sm:$0xff]  ;;  %1513 = vmatpush1.bf16.msra.mxu1 %v1512_v8  ;;  %v272_v25 = vld [vmem:[#allocation6 + $0x660] sm:$0xff] }
  0x55   :  { %v217_v21 = vld [vmem:[#allocation6 + $0x4a8] sm:$0xff]  ;;  %1515 = vmatprep.subr.bf16.mxu1 %v1514_v11  ;;  %v1518_v23 = vpack.c.bf16 %v273_v15, %v261_v14  ;;  %v216_v30 = vld [vmem:[#allocation6 + $0x4a0] sm:$0xff]  ;;  %v1520_v32 = vpack.c.bf16 %v272_v25, %v260_v24 }
  0x56   :  { %v229_v22 = vld [vmem:[#allocation6 + $0x508] sm:$0xff]  ;;  %1633 = vmatpush1.bf16.msra.mxu0 %v1632_v16  ;;  %v228_v31 = vld [vmem:[#allocation6 + $0x500] sm:$0xff] }
  0x57   :  { %v285_v26 = vld [vmem:[#allocation6 + $0x6c8] sm:$0xff]  ;;  %1635 = vmatprep.subr.bf16.mxu0 %v1634_v17  ;;  %v1638_v29 = vpack.c.bf16 %v229_v22, %v217_v21  ;;  %v284_v36 = vld [vmem:[#allocation6 + $0x6c0] sm:$0xff]  ;;  %v1640_v41 = vpack.c.bf16 %v228_v31, %v216_v30 }
  0x58   :  { %v297_v27 = vld [vmem:[#allocation6 + $0x728] sm:$0xff]  ;;  %1517 = vmatpush1.bf16.msra.mxu1 %v1516_v20  ;;  %v296_v37 = vld [vmem:[#allocation6 + $0x720] sm:$0xff] }
  0x59   :  { %v241_v33 = vld [vmem:[#allocation6 + $0x568] sm:$0xff]  ;;  %1519 = vmatprep.subr.bf16.mxu1 %v1518_v23  ;;  %v1522_v35 = vpack.c.bf16 %v297_v27, %v285_v26  ;;  %v240_v43 = vld [vmem:[#allocation6 + $0x560] sm:$0xff]  ;;  %v1524_v45 = vpack.c.bf16 %v296_v37, %v284_v36 }
  0x5a   :  { %v253_v34 = vld [vmem:[#allocation6 + $0x5c8] sm:$0xff]  ;;  %1637 = vmatpush1.bf16.msra.mxu0 %v1636_v28  ;;  %v252_v44 = vld [vmem:[#allocation6 + $0x5c0] sm:$0xff] }
  0x5b   :  { %v2326_v38 = vld [vmem:[#allocation3 + $0x8] sm:$0xff]  ;;  %1639 = vmatprep.subr.bf16.mxu0 %v1638_v29  ;;  %v1642_v42 = vpack.c.bf16 %v253_v34, %v241_v33  ;;  %v308_v49 = vld [vmem:[#allocation6 + $0x780] sm:$0xff]  ;;  %v1644_v53 = vpack.c.bf16 %v252_v44, %v240_v43 }
  0x5c   :  { %v309_v39 = vld [vmem:[#allocation6 + $0x788] sm:$0xff]  ;;  %516 = vmatprep.mubr.f32.mxu1 %v2326_v38  ;;  %670 = vmatprep.mubr.f32.mxu0 %v2326_v38  ;;  %v320_v50 = vld [vmem:[#allocation6 + $0x7e0] sm:$0xff] }
  0x5d   :  { %v321_v40 = vld [vmem:[#allocation6 + $0x7e8] sm:$0xff]  ;;  %1521 = vmatpush1.bf16.msra.mxu1 %v1520_v32  ;;  %v264_v55 = vld [vmem:[#allocation6 + $0x620] sm:$0xff]  ;;  %v1528_v57 = vpack.c.bf16 %v320_v50, %v308_v49  ;;  %v83_v49 = vld [vmem:[#allocation6 + $0x78] sm:$0xff] }
  0x5e   :  { %v265_v46 = vld [vmem:[#allocation6 + $0x628] sm:$0xff]  ;;  %1523 = vmatprep.subr.bf16.mxu1 %v1522_v35  ;;  %v1526_v48 = vpack.c.bf16 %v321_v40, %v309_v39  ;;  %1641 = vmatpush1.bf16.msra.mxu0 %v1640_v41  ;;  %v276_v56 = vld [vmem:[#allocation6 + $0x680] sm:$0xff] }
  0x5f   :  { %v277_v47 = vld [vmem:[#allocation6 + $0x688] sm:$0xff]  ;;  %1643 = vmatprep.subr.bf16.mxu0 %v1642_v42  ;;  %v332_v61 = vld [vmem:[#allocation6 + $0x840] sm:$0xff]  ;;  %v1648_v1 = vpack.c.bf16 %v276_v56, %v264_v55 }
  0x60   :  { %v333_v51 = vld [vmem:[#allocation6 + $0x848] sm:$0xff]  ;;  %v1646_v54 = vpack.c.bf16 %v277_v47, %v265_v46  ;;  %v344_v62 = vld [vmem:[#allocation6 + $0x8a0] sm:$0xff] }
  0x61   :  { %v345_v52 = vld [vmem:[#allocation6 + $0x8a8] sm:$0xff]  ;;  %1525 = vmatpush1.bf16.msra.mxu1 %v1524_v45  ;;  %v288_v3 = vld [vmem:[#allocation6 + $0x6e0] sm:$0xff]  ;;  %v1532_v5 = vpack.c.bf16 %v344_v62, %v332_v61  ;;  %v107_v61 = vld [vmem:[#allocation6 + $0x138] sm:$0xff] }
  0x62   :  { %v289_v58 = vld [vmem:[#allocation6 + $0x6e8] sm:$0xff]  ;;  %1527 = vmatprep.subr.bf16.mxu1 %v1526_v48  ;;  %v1530_v60 = vpack.c.bf16 %v345_v52, %v333_v51  ;;  %1645 = vmatpush1.bf16.msra.mxu0 %v1644_v53  ;;  %v300_v4 = vld [vmem:[#allocation6 + $0x740] sm:$0xff]  ;;  %v71_v48 = vld [vmem:[#allocation6 + $0x18] sm:$0xff] }
  0x63   :  { %v301_v59 = vld [vmem:[#allocation6 + $0x748] sm:$0xff]  ;;  %1647 = vmatprep.subr.bf16.mxu0 %v1646_v54  ;;  %v356_v9 = vld [vmem:[#allocation6 + $0x900] sm:$0xff]  ;;  %v1652_v13 = vpack.c.bf16 %v300_v4, %v288_v3 }
  0x64   :  { %v357_v63 = vld [vmem:[#allocation6 + $0x908] sm:$0xff]  ;;  %v1650_v2 = vpack.c.bf16 %v301_v59, %v289_v58  ;;  %v368_v10 = vld [vmem:[#allocation6 + $0x960] sm:$0xff]  ;;  %v70_v58 = vld [vmem:[#allocation6 + $0x10] sm:$0xff] }
  0x65   :  { %v369_v0 = vld [vmem:[#allocation6 + $0x968] sm:$0xff]  ;;  %1529 = vmatpush1.bf16.msra.mxu1 %v1528_v57  ;;  %v312_v15 = vld [vmem:[#allocation6 + $0x7a0] sm:$0xff]  ;;  %v1536_v17 = vpack.c.bf16 %v368_v10, %v356_v9  ;;  %v1550_v57 = vpack.c.bf16 %v83_v49, %v71_v48  ;;  %v82_v59 = vld [vmem:[#allocation6 + $0x70] sm:$0xff] }
  0x66   :  { %v313_v6 = vld [vmem:[#allocation6 + $0x7a8] sm:$0xff]  ;;  %1531 = vmatprep.subr.bf16.mxu1 %v1530_v60  ;;  %v1534_v8 = vpack.c.bf16 %v369_v0, %v357_v63  ;;  %1649 = vmatpush1.bf16.msra.mxu0 %v1648_v1  ;;  %v324_v16 = vld [vmem:[#allocation6 + $0x800] sm:$0xff]  ;;  %v95_v60 = vld [vmem:[#allocation6 + $0xd8] sm:$0xff]  ;;  %v1552_v3 = vpack.c.bf16 %v82_v59, %v70_v58 }
  0x67   :  { %v325_v7 = vld [vmem:[#allocation6 + $0x808] sm:$0xff]  ;;  %1651 = vmatprep.subr.bf16.mxu0 %v1650_v2  ;;  %v380_v21 = vld [vmem:[#allocation6 + $0x9c0] sm:$0xff]  ;;  %v1656_v25 = vpack.c.bf16 %v324_v16, %v312_v15  ;;  %v2332_v9 = vld [vmem:[#allocation3 + $0x18] sm:$0xff] }
  0x68   :  { %v381_v11 = vld [vmem:[#allocation6 + $0x9c8] sm:$0xff]  ;;  %v1654_v14 = vpack.c.bf16 %v325_v7, %v313_v6  ;;  %v392_v22 = vld [vmem:[#allocation6 + $0xa20] sm:$0xff]  ;;  %v1554_v6 = vpack.c.bf16 %v107_v61, %v95_v60  ;;  %v94_v7 = vld [vmem:[#allocation6 + $0xd0] sm:$0xff] }
  0x69   :  { %v393_v12 = vld [vmem:[#allocation6 + $0xa28] sm:$0xff]  ;;  %1533 = vmatpush1.bf16.msra.mxu1 %v1532_v5  ;;  %v336_v27 = vld [vmem:[#allocation6 + $0x860] sm:$0xff]  ;;  %v1540_v29 = vpack.c.bf16 %v392_v22, %v380_v21  ;;  %v119_v10 = vld [vmem:[#allocation6 + $0x198] sm:$0xff] }
  0x6a   :  { %v337_v18 = vld [vmem:[#allocation6 + $0x868] sm:$0xff]  ;;  %1535 = vmatprep.subr.bf16.mxu1 %v1534_v8  ;;  %v1538_v20 = vpack.c.bf16 %v393_v12, %v381_v11  ;;  %1653 = vmatpush1.bf16.msra.mxu0 %v1652_v13  ;;  %v348_v28 = vld [vmem:[#allocation6 + $0x8c0] sm:$0xff]  ;;  %v106_v8 = vld [vmem:[#allocation6 + $0x130] sm:$0xff] }
  0x6b   :  { %v349_v19 = vld [vmem:[#allocation6 + $0x8c8] sm:$0xff]  ;;  %1655 = vmatprep.subr.bf16.mxu0 %v1654_v14  ;;  %v404_v33 = vld [vmem:[#allocation6 + $0xa80] sm:$0xff]  ;;  %v1660_v37 = vpack.c.bf16 %v348_v28, %v336_v27  ;;  %v131_v11 = vld [vmem:[#allocation6 + $0x1f8] sm:$0xff]  ;;  %v1556_v16 = vpack.c.bf16 %v106_v8, %v94_v7 }
  0x6c   :  { %v405_v23 = vld [vmem:[#allocation6 + $0xa88] sm:$0xff]  ;;  %v1658_v26 = vpack.c.bf16 %v349_v19, %v337_v18  ;;  %v416_v34 = vld [vmem:[#allocation6 + $0xae0] sm:$0xff]  ;;  %v2336_v19 = vld [vmem:[#allocation3 + $0x10] sm:$0xff] }
  0x6d   :  { %v417_v24 = vld [vmem:[#allocation6 + $0xae8] sm:$0xff]  ;;  %1537 = vmatpush1.bf16.msra.mxu1 %v1536_v17  ;;  %v360_v40 = vld [vmem:[#allocation6 + $0x920] sm:$0xff]  ;;  %v1544_v42 = vpack.c.bf16 %v416_v34, %v404_v33  ;;  %v118_v21 = vld [vmem:[#allocation6 + $0x190] sm:$0xff] }
  0x6e   :  { %v361_v30 = vld [vmem:[#allocation6 + $0x928] sm:$0xff]  ;;  %1539 = vmatprep.subr.bf16.mxu1 %v1538_v20  ;;  %v1542_v32 = vpack.c.bf16 %v417_v24, %v405_v23  ;;  %1657 = vmatpush1.bf16.msra.mxu0 %v1656_v25  ;;  %v372_v41 = vld [vmem:[#allocation6 + $0x980] sm:$0xff]  ;;  %v1558_v20 = vpack.c.bf16 %v131_v11, %v119_v10  ;;  %v130_v22 = vld [vmem:[#allocation6 + $0x1f0] sm:$0xff] }
  0x6f   :  { %v373_v31 = vld [vmem:[#allocation6 + $0x988] sm:$0xff]  ;;  %1659 = vmatprep.subr.bf16.mxu0 %v1658_v26  ;;  %v428_v46 = vld [vmem:[#allocation6 + $0xb40] sm:$0xff]  ;;  %v1664_v50 = vpack.c.bf16 %v372_v41, %v360_v40  ;;  %v143_v23 = vld [vmem:[#allocation6 + $0x258] sm:$0xff] }
  0x70   :  { %v429_v35 = vld [vmem:[#allocation6 + $0xb48] sm:$0xff]  ;;  %v1662_v39 = vpack.c.bf16 %v373_v31, %v361_v30  ;;  %v440_v47 = vld [vmem:[#allocation6 + $0xba0] sm:$0xff]  ;;  %v155_v24 = vld [vmem:[#allocation6 + $0x2b8] sm:$0xff] }
  0x71   :  { %v441_v36 = vld [vmem:[#allocation6 + $0xba8] sm:$0xff]  ;;  %1541 = vmatpush1.bf16.msra.mxu1 %v1540_v29  ;;  %v384_v52 = vld [vmem:[#allocation6 + $0x9e0] sm:$0xff]  ;;  %v1548_v54 = vpack.c.bf16 %v440_v47, %v428_v46  ;;  %v1560_v29 = vpack.c.bf16 %v130_v22, %v118_v21  ;;  %v142_v33 = vld [vmem:[#allocation6 + $0x250] sm:$0xff] }
  0x72   :  { %v385_v43 = vld [vmem:[#allocation6 + $0x9e8] sm:$0xff]  ;;  %1543 = vmatprep.subr.bf16.mxu1 %v1542_v32  ;;  %v1546_v45 = vpack.c.bf16 %v441_v36, %v429_v35  ;;  %1661 = vmatpush1.bf16.msra.mxu0 %v1660_v37  ;;  %v396_v53 = vld [vmem:[#allocation6 + $0xa40] sm:$0xff]  ;;  %v1562_v32 = vpack.c.bf16 %v155_v24, %v143_v23  ;;  %v154_v34 = vld [vmem:[#allocation6 + $0x2b0] sm:$0xff] }
  0x73   :  { %v397_v44 = vld [vmem:[#allocation6 + $0xa48] sm:$0xff]  ;;  %1663 = vmatprep.subr.bf16.mxu0 %v1662_v39  ;;  %v1668_v62 = vpack.c.bf16 %v396_v53, %v384_v52  ;;  %v408_v0 = vld [vmem:[#allocation6 + $0xaa0] sm:$0xff]  ;;  %v167_v35 = vld [vmem:[#allocation6 + $0x318] sm:$0xff] }
  0x74   :  { %v1666_v51 = vpack.c.bf16 %v397_v44, %v385_v43  ;;  %v409_v55 = vld [vmem:[#allocation6 + $0xaa8] sm:$0xff]  ;;  %v420_v1 = vld [vmem:[#allocation6 + $0xb00] sm:$0xff]  ;;  %v179_v36 = vld [vmem:[#allocation6 + $0x378] sm:$0xff] }
  0x75   :  { %1545 = vmatpush1.bf16.msra.mxu1 %v1544_v42  ;;  %v421_v56 = vld [vmem:[#allocation6 + $0xb08] sm:$0xff]  ;;  %v2330_v2 = vld [vmem:[#allocation3] sm:$0xff]  ;;  %v1672_v12 = vpack.c.bf16 %v420_v1, %v408_v0  ;;  %v1564_v42 = vpack.c.bf16 %v154_v34, %v142_v33  ;;  %v166_v46 = vld [vmem:[#allocation6 + $0x310] sm:$0xff] }
  0x76   :  { %1547 = vmatprep.subr.bf16.mxu1 %v1546_v45  ;;  %1665 = vmatpush1.bf16.msra.mxu0 %v1664_v50  ;;  %v1670_v63 = vpack.c.bf16 %v421_v56, %v409_v55  ;;  %v433_v4 = vld [vmem:[#allocation6 + $0xb68] sm:$0xff]  ;;  %v432_v14 = vld [vmem:[#allocation6 + $0xb60] sm:$0xff]  ;;  %v1566_v45 = vpack.c.bf16 %v179_v36, %v167_v35  ;;  %v178_v47 = vld [vmem:[#allocation6 + $0x370] sm:$0xff] }
  0x77   :  { %1667 = vmatprep.subr.bf16.mxu0 %v1666_v51  ;;  %v445_v5 = vld [vmem:[#allocation6 + $0xbc8] sm:$0xff]  ;;  %v444_v15 = vld [vmem:[#allocation6 + $0xbc0] sm:$0xff]  ;;  %v191_v48 = vld [vmem:[#allocation6 + $0x3d8] sm:$0xff] }
  0x78   :  { %v1674_v13 = vpack.c.bf16 %v445_v5, %v433_v4  ;;  %v77_v17 = vld [vmem:[#allocation6 + $0x48] sm:$0xff]  ;;  %v1676_v25 = vpack.c.bf16 %v444_v15, %v432_v14  ;;  %v76_v27 = vld [vmem:[#allocation6 + $0x40] sm:$0xff]  ;;  %v203_v49 = vld [vmem:[#allocation6 + $0x438] sm:$0xff] }
  0x79   :  { %1549 = vmatpush1.bf16.msra.mxu1 %v1548_v54  ;;  %v89_v18 = vld [vmem:[#allocation6 + $0xa8] sm:$0xff]  ;;  %v88_v28 = vld [vmem:[#allocation6 + $0xa0] sm:$0xff]  ;;  %v1568_v54 = vpack.c.bf16 %v178_v47, %v166_v46  ;;  %v190_v58 = vld [vmem:[#allocation6 + $0x3d0] sm:$0xff] }
  0x7a   :  { %1551 = vmatprep.subr.bf16.mxu1 %v1550_v57  ;;  %1669 = vmatpush1.bf16.msra.mxu0 %v1668_v62  ;;  %v1742_v26 = vpack.c.bf16 %v89_v18, %v77_v17  ;;  %v101_v30 = vld [vmem:[#allocation6 + $0x108] sm:$0xff]  ;;  %v1744_v37 = vpack.c.bf16 %v88_v28, %v76_v27  ;;  %v100_v40 = vld [vmem:[#allocation6 + $0x100] sm:$0xff]  ;;  %v1570_v57 = vpack.c.bf16 %v203_v49, %v191_v48  ;;  %v202_v59 = vld [vmem:[#allocation6 + $0x430] sm:$0xff] }
  0x7b   :  { %1671 = vmatprep.subr.bf16.mxu0 %v1670_v63  ;;  %v113_v31 = vld [vmem:[#allocation6 + $0x168] sm:$0xff]  ;;  %v112_v41 = vld [vmem:[#allocation6 + $0x160] sm:$0xff]  ;;  %v215_v60 = vld [vmem:[#allocation6 + $0x498] sm:$0xff] }
  0x7c   :  { %517 = vmatmul.mubr.f32.vlgmr.msra.gmra.mrb[0].mxu1 %v2330_v2  ;;  %v1746_v39 = vpack.c.bf16 %v113_v31, %v101_v30  ;;  %v125_v43 = vld [vmem:[#allocation6 + $0x1c8] sm:$0xff]  ;;  %v1748_v50 = vpack.c.bf16 %v112_v41, %v100_v40  ;;  %v124_v52 = vld [vmem:[#allocation6 + $0x1c0] sm:$0xff]  ;;  %v227_v61 = vld [vmem:[#allocation6 + $0x4f8] sm:$0xff] }
  0x7d   :  { %1553 = vmatpush1.bf16.msra.mxu1 %v1552_v3  ;;  %522 = vmatprep.mubr.f32.mxu1 %v2332_v9  ;;  %v137_v44 = vld [vmem:[#allocation6 + $0x228] sm:$0xff]  ;;  %v136_v53 = vld [vmem:[#allocation6 + $0x220] sm:$0xff]  ;;  %v1572_v3 = vpack.c.bf16 %v202_v59, %v190_v58  ;;  %v214_v7 = vld [vmem:[#allocation6 + $0x490] sm:$0xff] }
  0x7e   :  { %1555 = vmatprep.subr.bf16.mxu1 %v1554_v6  ;;  %1673 = vmatpush1.bf16.msra.mxu0 %v1672_v12  ;;  %v1750_v51 = vpack.c.bf16 %v137_v44, %v125_v43  ;;  %v149_v55 = vld [vmem:[#allocation6 + $0x288] sm:$0xff]  ;;  %v1752_v62 = vpack.c.bf16 %v136_v53, %v124_v52  ;;  %v148_v0 = vld [vmem:[#allocation6 + $0x280] sm:$0xff]  ;;  %v1574_v6 = vpack.c.bf16 %v227_v61, %v215_v60  ;;  %v226_v8 = vld [vmem:[#allocation6 + $0x4f0] sm:$0xff] }
  0x7f   :  { %1675 = vmatprep.subr.bf16.mxu0 %v1674_v13  ;;  %v161_v56 = vld [vmem:[#allocation6 + $0x2e8] sm:$0xff]  ;;  %v160_v1 = vld [vmem:[#allocation6 + $0x2e0] sm:$0xff]  ;;  %v239_v10 = vld [vmem:[#allocation6 + $0x558] sm:$0xff] }
  0x80   :  { %523 = vmatmul.mubr.f32.gmra.mrb[2].mxu1 %v2336_v19  ;;  %v1754_v63 = vpack.c.bf16 %v161_v56, %v149_v55  ;;  %v173_v4 = vld [vmem:[#allocation6 + $0x348] sm:$0xff]  ;;  %v251_v11 = vld [vmem:[#allocation6 + $0x5b8] sm:$0xff]  ;;  %v1756_v12 = vpack.c.bf16 %v160_v1, %v148_v0  ;;  %v172_v14 = vld [vmem:[#allocation6 + $0x340] sm:$0xff] }
  0x81   :  { %1557 = vmatpush1.bf16.msra.mxu1 %v1556_v16  ;;  %593 = vmatprep.mubr.f32.mxu1 %v2326_v38  ;;  %v185_v5 = vld [vmem:[#allocation6 + $0x3a8] sm:$0xff]  ;;  %v184_v15 = vld [vmem:[#allocation6 + $0x3a0] sm:$0xff]  ;;  %v1576_v16 = vpack.c.bf16 %v226_v8, %v214_v7  ;;  %v238_v21 = vld [vmem:[#allocation6 + $0x550] sm:$0xff] }
  0x82   :  { %1559 = vmatprep.subr.bf16.mxu1 %v1558_v20  ;;  %1677 = vmatpush1.bf16.msra.mxu0 %v1676_v25  ;;  %v1758_v13 = vpack.c.bf16 %v185_v5, %v173_v4  ;;  %v197_v17 = vld [vmem:[#allocation6 + $0x408] sm:$0xff]  ;;  %v1578_v20 = vpack.c.bf16 %v251_v11, %v239_v10  ;;  %v250_v22 = vld [vmem:[#allocation6 + $0x5b0] sm:$0xff]  ;;  %v263_v23 = vld [vmem:[#allocation6 + $0x618] sm:$0xff]  ;;  %v1760_v25 = vpack.c.bf16 %v184_v15, %v172_v14 }
  0x83   :  { %1743 = vmatprep.subr.bf16.mxu0 %v1742_v26  ;;  %v209_v18 = vld [vmem:[#allocation6 + $0x468] sm:$0xff]  ;;  %v275_v24 = vld [vmem:[#allocation6 + $0x678] sm:$0xff]  ;;  %v196_v27 = vld [vmem:[#allocation6 + $0x400] sm:$0xff] }
  0x84   :  { %v1762_v26 = vpack.c.bf16 %v209_v18, %v197_v17  ;;  %v208_v28 = vld [vmem:[#allocation6 + $0x460] sm:$0xff]  ;;  %v221_v30 = vld [vmem:[#allocation6 + $0x4c8] sm:$0xff]  ;;  %v262_v33 = vld [vmem:[#allocation6 + $0x610] sm:$0xff] }
  0x85   :  { %1561 = vmatpush1.bf16.msra.mxu1 %v1560_v29  ;;  %671 = vmatmul.mubr.f32.vlgmr.msra.gmra.mrb[0].mxu0 %v2330_v2  ;;  %v1580_v29 = vpack.c.bf16 %v250_v22, %v238_v21  ;;  %v233_v31 = vld [vmem:[#allocation6 + $0x528] sm:$0xff]  ;;  %v274_v34 = vld [vmem:[#allocation6 + $0x670] sm:$0xff]  ;;  %v287_v35 = vld [vmem:[#allocation6 + $0x6d8] sm:$0xff] }
  0x86   :  { %1563 = vmatprep.subr.bf16.mxu1 %v1562_v32  ;;  %1745 = vmatpush1.bf16.msra.mxu0 %v1744_v37  ;;  %v1582_v32 = vpack.c.bf16 %v275_v24, %v263_v23  ;;  %v299_v36 = vld [vmem:[#allocation6 + $0x738] sm:$0xff]  ;;  %v1764_v37 = vpack.c.bf16 %v208_v28, %v196_v27  ;;  %v220_v40 = vld [vmem:[#allocation6 + $0x4c0] sm:$0xff]  ;;  %v245_v43 = vld [vmem:[#allocation6 + $0x588] sm:$0xff] }
  0x87   :  { %676 = vmatprep.mubr.f32.mxu0 %v2332_v9  ;;  %1747 = vmatprep.subr.bf16.mxu0 %v1746_v39  ;;  %v1766_v39 = vpack.c.bf16 %v233_v31, %v221_v30  ;;  %v232_v41 = vld [vmem:[#allocation6 + $0x520] sm:$0xff]  ;;  %v257_v44 = vld [vmem:[#allocation6 + $0x5e8] sm:$0xff]  ;;  %v286_v46 = vld [vmem:[#allocation6 + $0x6d0] sm:$0xff] }
  0x88   :  { %v298_v47 = vld [vmem:[#allocation6 + $0x730] sm:$0xff]  ;;  %v311_v48 = vld [vmem:[#allocation6 + $0x798] sm:$0xff]  ;;  %v244_v52 = vld [vmem:[#allocation6 + $0x580] sm:$0xff] }
  0x89   :  { %1565 = vmatpush1.bf16.msra.mxu1 %v1564_v42  ;;  %677 = vmatmul.mubr.f32.gmra.mrb[2].mxu0 %v2336_v19  ;;  %v1584_v42 = vpack.c.bf16 %v274_v34, %v262_v33  ;;  %v323_v49 = vld [vmem:[#allocation6 + $0x7f8] sm:$0xff]  ;;  %v256_v53 = vld [vmem:[#allocation6 + $0x5e0] sm:$0xff]  ;;  %v269_v55 = vld [vmem:[#allocation6 + $0x648] sm:$0xff] }
  0x8a   :  { %1567 = vmatprep.subr.bf16.mxu1 %v1566_v45  ;;  %1749 = vmatpush1.bf16.msra.mxu0 %v1748_v50  ;;  %v1586_v45 = vpack.c.bf16 %v299_v36, %v287_v35  ;;  %v1768_v50 = vpack.c.bf16 %v232_v41, %v220_v40  ;;  %v281_v56 = vld [vmem:[#allocation6 + $0x6a8] sm:$0xff]  ;;  %v310_v58 = vld [vmem:[#allocation6 + $0x790] sm:$0xff]  ;;  %v335_v60 = vld [vmem:[#allocation6 + $0x858] sm:$0xff] }
  0x8b   :  { %824 = vmatprep.mubr.f32.mxu0 %v2326_v38  ;;  %1751 = vmatprep.subr.bf16.mxu0 %v1750_v51  ;;  %v1770_v51 = vpack.c.bf16 %v257_v44, %v245_v43  ;;  %v322_v59 = vld [vmem:[#allocation6 + $0x7f0] sm:$0xff]  ;;  %v347_v61 = vld [vmem:[#allocation6 + $0x8b8] sm:$0xff]  ;;  %v268_v0 = vld [vmem:[#allocation6 + $0x640] sm:$0xff] }
  0x8c   :  { %v280_v1 = vld [vmem:[#allocation6 + $0x6a0] sm:$0xff]  ;;  %v293_v4 = vld [vmem:[#allocation6 + $0x708] sm:$0xff]  ;;  %v334_v7 = vld [vmem:[#allocation6 + $0x850] sm:$0xff] }
  0x8d   :  { %1569 = vmatpush1.bf16.msra.mxu1 %v1568_v54  ;;  %v1588_v54 = vpack.c.bf16 %v298_v47, %v286_v46  ;;  %v305_v5 = vld [vmem:[#allocation6 + $0x768] sm:$0xff]  ;;  %v346_v8 = vld [vmem:[#allocation6 + $0x8b0] sm:$0xff]  ;;  %v359_v10 = vld [vmem:[#allocation6 + $0x918] sm:$0xff] }
  0x8e   :  { %1571 = vmatprep.subr.bf16.mxu1 %v1570_v57  ;;  %1753 = vmatpush1.bf16.msra.mxu0 %v1752_v62  ;;  %v1590_v57 = vpack.c.bf16 %v323_v49, %v311_v48  ;;  %v1772_v62 = vpack.c.bf16 %v256_v53, %v244_v52  ;;  %v371_v11 = vld [vmem:[#allocation6 + $0x978] sm:$0xff]  ;;  %v292_v14 = vld [vmem:[#allocation6 + $0x700] sm:$0xff]  ;;  %v317_v17 = vld [vmem:[#allocation6 + $0x7c8] sm:$0xff] }
  0x8f   :  { %1755 = vmatprep.subr.bf16.mxu0 %v1754_v63  ;;  %v1774_v63 = vpack.c.bf16 %v281_v56, %v269_v55  ;;  %v304_v15 = vld [vmem:[#allocation6 + $0x760] sm:$0xff]  ;;  %v329_v18 = vld [vmem:[#allocation6 + $0x828] sm:$0xff]  ;;  %v358_v21 = vld [vmem:[#allocation6 + $0x910] sm:$0xff] }
  0x90   :  { %v370_v22 = vld [vmem:[#allocation6 + $0x970] sm:$0xff]  ;;  %v383_v23 = vld [vmem:[#allocation6 + $0x9d8] sm:$0xff]  ;;  %v316_v27 = vld [vmem:[#allocation6 + $0x7c0] sm:$0xff] }
  0x91   :  { %1573 = vmatpush1.bf16.msra.mxu1 %v1572_v3  ;;  %v1592_v3 = vpack.c.bf16 %v322_v59, %v310_v58  ;;  %v395_v24 = vld [vmem:[#allocation6 + $0xa38] sm:$0xff]  ;;  %v328_v28 = vld [vmem:[#allocation6 + $0x820] sm:$0xff]  ;;  %v341_v30 = vld [vmem:[#allocation6 + $0x888] sm:$0xff] }
  0x92   :  { %1575 = vmatprep.subr.bf16.mxu1 %v1574_v6  ;;  %1757 = vmatpush1.bf16.msra.mxu0 %v1756_v12  ;;  %v1594_v6 = vpack.c.bf16 %v347_v61, %v335_v60  ;;  %v1776_v12 = vpack.c.bf16 %v280_v1, %v268_v0  ;;  %v353_v31 = vld [vmem:[#allocation6 + $0x8e8] sm:$0xff]  ;;  %v382_v33 = vld [vmem:[#allocation6 + $0x9d0] sm:$0xff]  ;;  %v407_v35 = vld [vmem:[#allocation6 + $0xa98] sm:$0xff] }
  0x93   :  { %1759 = vmatprep.subr.bf16.mxu0 %v1758_v13  ;;  %v1778_v13 = vpack.c.bf16 %v305_v5, %v293_v4  ;;  %v394_v34 = vld [vmem:[#allocation6 + $0xa30] sm:$0xff]  ;;  %v419_v36 = vld [vmem:[#allocation6 + $0xaf8] sm:$0xff]  ;;  %v340_v40 = vld [vmem:[#allocation6 + $0x880] sm:$0xff] }
  0x94   :  { %v352_v41 = vld [vmem:[#allocation6 + $0x8e0] sm:$0xff]  ;;  %v365_v43 = vld [vmem:[#allocation6 + $0x948] sm:$0xff]  ;;  %v406_v46 = vld [vmem:[#allocation6 + $0xa90] sm:$0xff] }
  0x95   :  { %1577 = vmatpush1.bf16.msra.mxu1 %v1576_v16  ;;  %v1596_v16 = vpack.c.bf16 %v346_v8, %v334_v7  ;;  %v377_v44 = vld [vmem:[#allocation6 + $0x9a8] sm:$0xff]  ;;  %v418_v47 = vld [vmem:[#allocation6 + $0xaf0] sm:$0xff]  ;;  %v431_v48 = vld [vmem:[#allocation6 + $0xb58] sm:$0xff] }
  0x96   :  { %1579 = vmatprep.subr.bf16.mxu1 %v1578_v20  ;;  %1761 = vmatpush1.bf16.msra.mxu0 %v1760_v25  ;;  %v1598_v20 = vpack.c.bf16 %v371_v11, %v359_v10  ;;  %v1780_v25 = vpack.c.bf16 %v304_v15, %v292_v14  ;;  %v443_v49 = vld [vmem:[#allocation6 + $0xbb8] sm:$0xff]  ;;  %v364_v52 = vld [vmem:[#allocation6 + $0x940] sm:$0xff]  ;;  %v389_v55 = vld [vmem:[#allocation6 + $0xa08] sm:$0xff] }
  0x97   :  { %1763 = vmatprep.subr.bf16.mxu0 %v1762_v26  ;;  %v1782_v26 = vpack.c.bf16 %v329_v18, %v317_v17  ;;  %v376_v53 = vld [vmem:[#allocation6 + $0x9a0] sm:$0xff]  ;;  %v401_v56 = vld [vmem:[#allocation6 + $0xa68] sm:$0xff]  ;;  %v430_v58 = vld [vmem:[#allocation6 + $0xb50] sm:$0xff] }
  0x98   :  { %v442_v59 = vld [vmem:[#allocation6 + $0xbb0] sm:$0xff]  ;;  %v75_v60 = vld [vmem:[#allocation6 + $0x38] sm:$0xff]  ;;  %v388_v0 = vld [vmem:[#allocation6 + $0xa00] sm:$0xff] }
  0x99   :  { %1581 = vmatpush1.bf16.msra.mxu1 %v1580_v29  ;;  %v1600_v29 = vpack.c.bf16 %v370_v22, %v358_v21  ;;  %v87_v61 = vld [vmem:[#allocation6 + $0x98] sm:$0xff]  ;;  %v400_v1 = vld [vmem:[#allocation6 + $0xa60] sm:$0xff]  ;;  %v413_v4 = vld [vmem:[#allocation6 + $0xac8] sm:$0xff] }
  0x9a   :  { %1583 = vmatprep.subr.bf16.mxu1 %v1582_v32  ;;  %1765 = vmatpush1.bf16.msra.mxu0 %v1764_v37  ;;  %v1602_v32 = vpack.c.bf16 %v395_v24, %v383_v23  ;;  %v1784_v37 = vpack.c.bf16 %v328_v28, %v316_v27  ;;  %v425_v5 = vld [vmem:[#allocation6 + $0xb28] sm:$0xff]  ;;  %v74_v7 = vld [vmem:[#allocation6 + $0x30] sm:$0xff]  ;;  %v99_v10 = vld [vmem:[#allocation6 + $0xf8] sm:$0xff] }
  0x9b   :  { %1767 = vmatprep.subr.bf16.mxu0 %v1766_v39  ;;  %v1786_v39 = vpack.c.bf16 %v353_v31, %v341_v30  ;;  %v86_v8 = vld [vmem:[#allocation6 + $0x90] sm:$0xff]  ;;  %v111_v11 = vld [vmem:[#allocation6 + $0x158] sm:$0xff]  ;;  %v412_v14 = vld [vmem:[#allocation6 + $0xac0] sm:$0xff] }
  0x9c   :  { %v424_v15 = vld [vmem:[#allocation6 + $0xb20] sm:$0xff]  ;;  %v437_v17 = vld [vmem:[#allocation6 + $0xb88] sm:$0xff]  ;;  %v98_v21 = vld [vmem:[#allocation6 + $0xf0] sm:$0xff] }
  0x9d   :  { %1585 = vmatpush1.bf16.msra.mxu1 %v1584_v42  ;;  %v1604_v42 = vpack.c.bf16 %v394_v34, %v382_v33  ;;  %v449_v18 = vld [vmem:[#allocation6 + $0xbe8] sm:$0xff]  ;;  %v110_v22 = vld [vmem:[#allocation6 + $0x150] sm:$0xff]  ;;  %v123_v23 = vld [vmem:[#allocation6 + $0x1b8] sm:$0xff] }
  0x9e   :  { %1587 = vmatprep.subr.bf16.mxu1 %v1586_v45  ;;  %1769 = vmatpush1.bf16.msra.mxu0 %v1768_v50  ;;  %v1606_v45 = vpack.c.bf16 %v419_v36, %v407_v35  ;;  %v1788_v50 = vpack.c.bf16 %v352_v41, %v340_v40  ;;  %v135_v24 = vld [vmem:[#allocation6 + $0x218] sm:$0xff]  ;;  %v436_v27 = vld [vmem:[#allocation6 + $0xb80] sm:$0xff]  ;;  %v122_v31 = vld [vmem:[#allocation6 + $0x1b0] sm:$0xff] }
  0x9f   :  { %1771 = vmatprep.subr.bf16.mxu0 %v1770_v51  ;;  %v1790_v51 = vpack.c.bf16 %v377_v44, %v365_v43  ;;  %v448_v28 = vld [vmem:[#allocation6 + $0xbe0] sm:$0xff]  ;;  %v1686_v30 = vpack.c.bf16 %v135_v24, %v123_v23  ;;  %v147_v33 = vld [vmem:[#allocation6 + $0x278] sm:$0xff]  ;;  %v158_v40 = vld [vmem:[#allocation6 + $0x2d0] sm:$0xff] }
  0xa0   :  { %v159_v34 = vld [vmem:[#allocation6 + $0x2d8] sm:$0xff]  ;;  %v1804_v35 = vpack.c.bf16 %v448_v28, %v436_v27 }
  0xa1   :  { %1589 = vmatpush1.bf16.msra.mxu1 %v1588_v54  ;;  %v1608_v54 = vpack.c.bf16 %v418_v47, %v406_v46  ;;  %v171_v41 = vld [vmem:[#allocation6 + $0x338] sm:$0xff]  ;;  %v182_v46 = vld [vmem:[#allocation6 + $0x390] sm:$0xff] }
  0xa2   :  { %1591 = vmatprep.subr.bf16.mxu1 %v1590_v57  ;;  %1773 = vmatpush1.bf16.msra.mxu0 %v1772_v62  ;;  %v1610_v57 = vpack.c.bf16 %v443_v49, %v431_v48  ;;  %v1792_v62 = vpack.c.bf16 %v376_v53, %v364_v52  ;;  %v195_v47 = vld [vmem:[#allocation6 + $0x3f8] sm:$0xff] }
  0xa3   :  { %1775 = vmatprep.subr.bf16.mxu0 %v1774_v63  ;;  %v1794_v63 = vpack.c.bf16 %v401_v56, %v389_v55  ;;  %v207_v48 = vld [vmem:[#allocation6 + $0x458] sm:$0xff]  ;;  %v218_v56 = vld [vmem:[#allocation6 + $0x4b0] sm:$0xff] }
  0xa4   :  { %v1698_v49 = vpack.c.bf16 %v207_v48, %v195_v47  ;;  %v219_v52 = vld [vmem:[#allocation6 + $0x4b8] sm:$0xff] }
  0xa5   :  { %1593 = vmatpush1.bf16.msra.mxu1 %v1592_v3  ;;  %v1612_v3 = vpack.c.bf16 %v442_v59, %v430_v58  ;;  %v231_v53 = vld [vmem:[#allocation6 + $0x518] sm:$0xff] }
  0xa6   :  { %1595 = vmatprep.subr.bf16.mxu1 %v1594_v6  ;;  %1777 = vmatpush1.bf16.msra.mxu0 %v1776_v12  ;;  %v1678_v6 = vpack.c.bf16 %v87_v61, %v75_v60  ;;  %v1796_v12 = vpack.c.bf16 %v400_v1, %v388_v0  ;;  %v1702_v55 = vpack.c.bf16 %v231_v53, %v219_v52  ;;  %v243_v58 = vld [vmem:[#allocation6 + $0x578] sm:$0xff] }
  0xa7   :  { %1779 = vmatprep.subr.bf16.mxu0 %v1778_v13  ;;  %v1798_v13 = vpack.c.bf16 %v425_v5, %v413_v4  ;;  %v255_v59 = vld [vmem:[#allocation6 + $0x5d8] sm:$0xff]  ;;  %v266_v5 = vld [vmem:[#allocation6 + $0x630] sm:$0xff] }
  0xa8   :  { %v1706_v61 = vpack.c.bf16 %v255_v59, %v243_v58  ;;  %v267_v0 = vld [vmem:[#allocation6 + $0x638] sm:$0xff] }
  0xa9   :  { %1597 = vmatpush1.bf16.msra.mxu1 %v1596_v16  ;;  %v1680_v16 = vpack.c.bf16 %v86_v8, %v74_v7  ;;  %v279_v1 = vld [vmem:[#allocation6 + $0x698] sm:$0xff] }
  0xaa   :  { %1599 = vmatprep.subr.bf16.mxu1 %v1598_v20  ;;  %1781 = vmatpush1.bf16.msra.mxu0 %v1780_v25  ;;  %v1682_v20 = vpack.c.bf16 %v111_v11, %v99_v10  ;;  %v1800_v25 = vpack.c.bf16 %v424_v15, %v412_v14  ;;  %v1710_v4 = vpack.c.bf16 %v279_v1, %v267_v0  ;;  %v291_v7 = vld [vmem:[#allocation6 + $0x6f8] sm:$0xff] }
  0xab   :  { %1783 = vmatprep.subr.bf16.mxu0 %v1782_v26  ;;  %v1802_v26 = vpack.c.bf16 %v449_v18, %v437_v17  ;;  %v303_v8 = vld [vmem:[#allocation6 + $0x758] sm:$0xff]  ;;  %v314_v18 = vld [vmem:[#allocation6 + $0x7b0] sm:$0xff] }
  0xac   :  { %v1714_v11 = vpack.c.bf16 %v303_v8, %v291_v7  ;;  %v315_v14 = vld [vmem:[#allocation6 + $0x7b8] sm:$0xff] }
  0xad   :  { %1601 = vmatpush1.bf16.msra.mxu1 %v1600_v29  ;;  %v1684_v29 = vpack.c.bf16 %v110_v22, %v98_v21  ;;  %v327_v15 = vld [vmem:[#allocation6 + $0x818] sm:$0xff] }
  0xae   :  { %1603 = vmatprep.subr.bf16.mxu1 %v1602_v32  ;;  %1785 = vmatpush1.bf16.msra.mxu0 %v1784_v37  ;;  %v134_v32 = vld [vmem:[#allocation6 + $0x210] sm:$0xff]  ;;  %v1690_v37 = vpack.c.bf16 %v159_v34, %v147_v33  ;;  %v1718_v17 = vpack.c.bf16 %v327_v15, %v315_v14  ;;  %v339_v21 = vld [vmem:[#allocation6 + $0x878] sm:$0xff] }
  0xaf   :  { %1787 = vmatprep.subr.bf16.mxu0 %v1786_v39  ;;  %v1688_v36 = vpack.c.bf16 %v134_v32, %v122_v31  ;;  %v146_v39 = vld [vmem:[#allocation6 + $0x270] sm:$0xff]  ;;  %v351_v22 = vld [vmem:[#allocation6 + $0x8d8] sm:$0xff] }
  0xb0   :  { %v1692_v43 = vpack.c.bf16 %v158_v40, %v146_v39  ;;  %v1722_v24 = vpack.c.bf16 %v351_v22, %v339_v21  ;;  %v363_v27 = vld [vmem:[#allocation6 + $0x938] sm:$0xff]  ;;  %v362_v31 = vld [vmem:[#allocation6 + $0x930] sm:$0xff] }
  0xb1   :  { %1605 = vmatpush1.bf16.msra.mxu1 %v1604_v42  ;;  %v183_v42 = vld [vmem:[#allocation6 + $0x398] sm:$0xff]  ;;  %v374_v32 = vld [vmem:[#allocation6 + $0x990] sm:$0xff] }
  0xb2   :  { %1607 = vmatprep.subr.bf16.mxu1 %v1606_v45  ;;  %1789 = vmatpush1.bf16.msra.mxu0 %v1788_v50  ;;  %v1694_v44 = vpack.c.bf16 %v183_v42, %v171_v41  ;;  %v170_v45 = vld [vmem:[#allocation6 + $0x330] sm:$0xff]  ;;  %v375_v28 = vld [vmem:[#allocation6 + $0x998] sm:$0xff] }
  0xb3   :  { %1791 = vmatprep.subr.bf16.mxu0 %v1790_v51  ;;  %v194_v50 = vld [vmem:[#allocation6 + $0x3f0] sm:$0xff]  ;;  %v387_v33 = vld [vmem:[#allocation6 + $0x9f8] sm:$0xff] }
  0xb4   :  { %v206_v51 = vld [vmem:[#allocation6 + $0x450] sm:$0xff]  ;;  %v399_v34 = vld [vmem:[#allocation6 + $0xa58] sm:$0xff] }
  0xb5   :  { %1609 = vmatpush1.bf16.msra.mxu1 %v1608_v54  ;;  %v1700_v54 = vpack.c.bf16 %v206_v51, %v194_v50  ;;  %v398_v39 = vld [vmem:[#allocation6 + $0xa50] sm:$0xff]  ;;  %v411_v40 = vld [vmem:[#allocation6 + $0xab8] sm:$0xff] }
  0xb6   :  { %1611 = vmatprep.subr.bf16.mxu1 %v1610_v57  ;;  %1793 = vmatpush1.bf16.msra.mxu0 %v1792_v62  ;;  %v230_v57 = vld [vmem:[#allocation6 + $0x510] sm:$0xff]  ;;  %v423_v41 = vld [vmem:[#allocation6 + $0xb18] sm:$0xff] }
  0xb7   :  { %1795 = vmatprep.subr.bf16.mxu0 %v1794_v63  ;;  %v1704_v60 = vpack.c.bf16 %v230_v57, %v218_v56  ;;  %v242_v62 = vld [vmem:[#allocation6 + $0x570] sm:$0xff]  ;;  %v447_v47 = vld [vmem:[#allocation6 + $0xbd8] sm:$0xff] }
  0xb8   :  { %v254_v63 = vld [vmem:[#allocation6 + $0x5d0] sm:$0xff]  ;;  %v79_v51 = vld [vmem:[#allocation6 + $0x58] sm:$0xff] }
  0xb9   :  { %1613 = vmatpush1.bf16.msra.mxu1 %v1612_v3  ;;  %v1708_v3 = vpack.c.bf16 %v254_v63, %v242_v62  ;;  %v446_v50 = vld [vmem:[#allocation6 + $0xbd0] sm:$0xff]  ;;  %v91_v52 = vld [vmem:[#allocation6 + $0xb8] sm:$0xff] }
  0xba   :  { %1679 = vmatprep.subr.bf16.mxu1 %v1678_v6  ;;  %1797 = vmatpush1.bf16.msra.mxu0 %v1796_v12  ;;  %v278_v6 = vld [vmem:[#allocation6 + $0x690] sm:$0xff]  ;;  %v103_v57 = vld [vmem:[#allocation6 + $0x118] sm:$0xff] }
  0xbb   :  { %1799 = vmatprep.subr.bf16.mxu0 %v1798_v13  ;;  %v1712_v10 = vpack.c.bf16 %v278_v6, %v266_v5  ;;  %v290_v12 = vld [vmem:[#allocation6 + $0x6f0] sm:$0xff]  ;;  %v115_v58 = vld [vmem:[#allocation6 + $0x178] sm:$0xff] }
  0xbc   :  { %594 = vmatmul.mubr.f32.vlgmr.msra.gmra.mrb[4].mxu1 %v2330_v2  ;;  %v302_v13 = vld [vmem:[#allocation6 + $0x750] sm:$0xff]  ;;  %v127_v63 = vld [vmem:[#allocation6 + $0x1d8] sm:$0xff] }
  0xbd   :  { %1681 = vmatpush1.bf16.msra.mxu1 %v1680_v16  ;;  %599 = vmatprep.mubr.f32.mxu1 %v2332_v9  ;;  %v1716_v16 = vpack.c.bf16 %v302_v13, %v290_v12  ;;  %v90_v56 = vld [vmem:[#allocation6 + $0xb0] sm:$0xff]  ;;  %v139_v0 = vld [vmem:[#allocation6 + $0x238] sm:$0xff] }
  0xbe   :  { %1683 = vmatprep.subr.bf16.mxu1 %v1682_v20  ;;  %1801 = vmatpush1.bf16.msra.mxu0 %v1800_v25  ;;  %v326_v20 = vld [vmem:[#allocation6 + $0x810] sm:$0xff]  ;;  %v151_v6 = vld [vmem:[#allocation6 + $0x298] sm:$0xff] }
  0xbf   :  { %1803 = vmatprep.subr.bf16.mxu0 %v1802_v26  ;;  %v1720_v23 = vpack.c.bf16 %v326_v20, %v314_v18  ;;  %v338_v25 = vld [vmem:[#allocation6 + $0x870] sm:$0xff]  ;;  %v163_v7 = vld [vmem:[#allocation6 + $0x2f8] sm:$0xff] }
  0xc0   :  { %600 = vmatmul.mubr.f32.gmra.mrb[6].mxu1 %v2336_v19  ;;  %v350_v26 = vld [vmem:[#allocation6 + $0x8d0] sm:$0xff]  ;;  %v175_v13 = vld [vmem:[#allocation6 + $0x358] sm:$0xff] }
  0xc1   :  { %1685 = vmatpush1.bf16.msra.mxu1 %v1684_v29  ;;  %747 = vmatprep.mubr.f32.mxu1 %v2326_v38  ;;  %v1696_v38 = vpack.c.bf16 %v182_v46, %v170_v45  ;;  %v1724_v29 = vpack.c.bf16 %v350_v26, %v338_v25  ;;  %v422_v45 = vld [vmem:[#allocation6 + $0xb10] sm:$0xff]  ;;  %v435_v46 = vld [vmem:[#allocation6 + $0xb78] sm:$0xff] }
  0xc2   :  { %1687 = vmatprep.subr.bf16.mxu1 %v1686_v30  ;;  %1805 = vmatpush1.bf16.msra.mxu0 %v1804_v35  ;;  %v1726_v30 = vpack.c.bf16 %v375_v28, %v363_v27  ;;  %v1728_v35 = vpack.c.bf16 %v374_v32, %v362_v31  ;;  %v114_v62 = vld [vmem:[#allocation6 + $0x170] sm:$0xff]  ;;  %v187_v14 = vld [vmem:[#allocation6 + $0x3b8] sm:$0xff]  ;;  %v1015_v32 = vld [vmem:[#allocation8 + $0x8] sm:$0xff] }
  0xc3   :  { %v138_v5 = vld [vmem:[#allocation6 + $0x230] sm:$0xff]  ;;  %v1822_v15 = vpack.c.bf16 %v187_v14, %v175_v13  ;;  %v199_v18 = vld [vmem:[#allocation6 + $0x418] sm:$0xff] }
  0xc4   :  { %v150_v12 = vld [vmem:[#allocation6 + $0x290] sm:$0xff]  ;;  %v211_v20 = vld [vmem:[#allocation6 + $0x478] sm:$0xff] }
  0xc5   :  { %1689 = vmatpush1.bf16.msra.mxu1 %v1688_v36  ;;  %825 = vmatmul.mubr.f32.vlgmr.msra.gmra.mrb[4].mxu0 %v2330_v2  ;;  %v1730_v36 = vpack.c.bf16 %v399_v34, %v387_v33  ;;  %v1826_v21 = vpack.c.bf16 %v211_v20, %v199_v18  ;;  %v198_v22 = vld [vmem:[#allocation6 + $0x410] sm:$0xff]  ;;  %v235_v25 = vld [vmem:[#allocation6 + $0x538] sm:$0xff] }
  0xc6   :  { %1691 = vmatprep.subr.bf16.mxu1 %v1690_v37  ;;  %830 = vmatprep.mubr.f32.mxu0 %v2332_v9  ;;  %v386_v37 = vld [vmem:[#allocation6 + $0x9f0] sm:$0xff]  ;;  %v259_v31 = vld [vmem:[#allocation6 + $0x5f8] sm:$0xff] }
  0xc7   :  { %v1732_v42 = vpack.c.bf16 %v398_v39, %v386_v37  ;;  %v222_v28 = vld [vmem:[#allocation6 + $0x4d0] sm:$0xff]  ;;  %v1017_v33 = vld [vmem:[#allocation8 + $0x18] sm:$0xff] }
  0xc8   :  { %v1016_v37 = vld [vmem:[#allocation8 + $0x10] sm:$0xff] }
  0xc9   :  { %1693 = vmatpush1.bf16.msra.mxu1 %v1692_v43  ;;  %831 = vmatmul.mubr.f32.gmra.mrb[6].mxu0 %v2336_v19  ;;  %v1734_v43 = vpack.c.bf16 %v423_v41, %v411_v40  ;;  %v246_v40 = vld [vmem:[#allocation6 + $0x590] sm:$0xff] }
  0xca   :  { %1695 = vmatprep.subr.bf16.mxu1 %v1694_v44  ;;  %v410_v44 = vld [vmem:[#allocation6 + $0xab0] sm:$0xff] }
  0xcb   :  { %v1736_v48 = vpack.c.bf16 %v422_v45, %v410_v44  ;;  %v258_v41 = vld [vmem:[#allocation6 + $0x5f0] sm:$0xff]  ;;  %v283_v44 = vld [vmem:[#allocation6 + $0x6b8] sm:$0xff]  ;;  %v1019_v45 = vld [vmem:[#allocation8 + $0x28] sm:$0xff] }
  0xcc   :  { %v330_v13 = vld [vmem:[#allocation6 + $0x830] sm:$0xff] }
  0xcd   :  { %1697 = vmatpush1.bf16.msra.mxu1 %v1696_v38  ;;  %v1738_v38 = vpack.c.bf16 %v447_v47, %v435_v46  ;;  %v1021_v46 = vld [vmem:[#allocation8 + $0x38] sm:$0xff]  ;;  %v1836_v47 = vpack.c.bf16 %v258_v41, %v246_v40  ;;  %v1039_v41 = vld [vmem:[#allocation8 + $0xc8] sm:$0xff] }
  0xce   :  { %1699 = vmatprep.subr.bf16.mxu1 %v1698_v49  ;;  %v434_v49 = vld [vmem:[#allocation6 + $0xb70] sm:$0xff]  ;;  %v403_v40 = vld [vmem:[#allocation6 + $0xa78] sm:$0xff] }
  0xcf   :  { %v1740_v53 = vpack.c.bf16 %v446_v50, %v434_v49  ;;  %v1020_v49 = vld [vmem:[#allocation8 + $0x30] sm:$0xff] }
  0xd1   :  { %1701 = vmatpush1.bf16.msra.mxu1 %v1700_v54  ;;  %v1806_v54 = vpack.c.bf16 %v91_v52, %v79_v51  ;;  %v270_v51 = vld [vmem:[#allocation6 + $0x650] sm:$0xff] }
  0xd2   :  { %1703 = vmatprep.subr.bf16.mxu1 %v1702_v55  ;;  %v78_v55 = vld [vmem:[#allocation6 + $0x50] sm:$0xff] }
  0xd3   :  { %v1808_v59 = vpack.c.bf16 %v90_v56, %v78_v55  ;;  %v282_v52 = vld [vmem:[#allocation6 + $0x6b0] sm:$0xff]  ;;  %v307_v55 = vld [vmem:[#allocation6 + $0x778] sm:$0xff]  ;;  %v1023_v56 = vld [vmem:[#allocation8 + $0x48] sm:$0xff] }
  0xd5   :  { %1705 = vmatpush1.bf16.msra.mxu1 %v1704_v60  ;;  %v1810_v60 = vpack.c.bf16 %v115_v58, %v103_v57  ;;  %v1025_v57 = vld [vmem:[#allocation8 + $0x58] sm:$0xff]  ;;  %v1840_v58 = vpack.c.bf16 %v282_v52, %v270_v51  ;;  %v1043_v52 = vld [vmem:[#allocation8 + $0xe8] sm:$0xff] }
  0xd6   :  { %1707 = vmatprep.subr.bf16.mxu1 %v1706_v61  ;;  %v102_v61 = vld [vmem:[#allocation6 + $0x110] sm:$0xff]  ;;  %v427_v51 = vld [vmem:[#allocation6 + $0xb38] sm:$0xff] }
  0xd7   :  { %v1812_v1 = vpack.c.bf16 %v114_v62, %v102_v61  ;;  %v1024_v61 = vld [vmem:[#allocation8 + $0x50] sm:$0xff] }
  0xd9   :  { %1709 = vmatpush1.bf16.msra.mxu1 %v1708_v3  ;;  %v1814_v3 = vpack.c.bf16 %v139_v0, %v127_v63  ;;  %v294_v63 = vld [vmem:[#allocation6 + $0x710] sm:$0xff] }
  0xda   :  { %1711 = vmatprep.subr.bf16.mxu1 %v1710_v4  ;;  %v126_v4 = vld [vmem:[#allocation6 + $0x1d0] sm:$0xff] }
  0xdb   :  { %v1816_v8 = vpack.c.bf16 %v138_v5, %v126_v4  ;;  %v306_v0 = vld [vmem:[#allocation6 + $0x770] sm:$0xff]  ;;  %v331_v4 = vld [vmem:[#allocation6 + $0x838] sm:$0xff]  ;;  %v1027_v5 = vld [vmem:[#allocation8 + $0x68] sm:$0xff] }
  0xdd   :  { %1713 = vmatpush1.bf16.msra.mxu1 %v1712_v10  ;;  %v2158_v10 = vld [vmem:[#allocation3 + $0x8] sm:$0xff] }
  0xde   :  { %1715 = vmatprep.subr.bf16.mxu1 %v1714_v11  ;;  %v1818_v11 = vpack.c.bf16 %v163_v7, %v151_v6  ;;  %v1029_v6 = vld [vmem:[#allocation8 + $0x78] sm:$0xff]  ;;  %v1844_v7 = vpack.c.bf16 %v306_v0, %v294_v63  ;;  %v1047_v0 = vld [vmem:[#allocation8 + $0x108] sm:$0xff] }
  0xe1   :  { %1717 = vmatpush1.bf16.msra.mxu1 %v1716_v16  ;;  %v174_v16 = vld [vmem:[#allocation6 + $0x350] sm:$0xff] }
  0xe2   :  { %1719 = vmatprep.subr.bf16.mxu1 %v1718_v17  ;;  %v186_v17 = vld [vmem:[#allocation6 + $0x3b0] sm:$0xff] }
  0xe5   :  { %1721 = vmatpush1.bf16.msra.mxu1 %v1720_v23  ;;  %v210_v23 = vld [vmem:[#allocation6 + $0x470] sm:$0xff] }
  0xe6   :  { %1723 = vmatprep.subr.bf16.mxu1 %v1722_v24  ;;  %v223_v24 = vld [vmem:[#allocation6 + $0x4d8] sm:$0xff]  ;;  %v1828_v26 = vpack.c.bf16 %v210_v23, %v198_v22  ;;  %v342_v23 = vld [vmem:[#allocation6 + $0x890] sm:$0xff] }
  0xe7   :  { %v1830_v27 = vpack.c.bf16 %v235_v25, %v223_v24  ;;  %v354_v24 = vld [vmem:[#allocation6 + $0x8f0] sm:$0xff] }
  0xe9   :  { %1725 = vmatpush1.bf16.msra.mxu1 %v1724_v29  ;;  %v234_v29 = vld [vmem:[#allocation6 + $0x530] sm:$0xff] }
  0xea   :  { %1727 = vmatprep.subr.bf16.mxu1 %v1726_v30  ;;  %v247_v30 = vld [vmem:[#allocation6 + $0x598] sm:$0xff]  ;;  %v1832_v34 = vpack.c.bf16 %v234_v29, %v222_v28  ;;  %v1035_v28 = vld [vmem:[#allocation8 + $0xa8] sm:$0xff] }
  0xeb   :  { %v1834_v39 = vpack.c.bf16 %v259_v31, %v247_v30  ;;  %v1037_v29 = vld [vmem:[#allocation8 + $0xb8] sm:$0xff]  ;;  %v1852_v30 = vpack.c.bf16 %v354_v24, %v342_v23 }
  0xec   :  { %v1890_v31 = vpack.c.bf16 %v1037_v29, %v1035_v28  ;;  %v1061_v23 = vld [vmem:[#allocation8 + $0x178] sm:$0xff]  ;;  %v1063_v28 = vld [vmem:[#allocation8 + $0x188] sm:$0xff] }
  0xed   :  { %1729 = vmatpush1.bf16.msra.mxu1 %v1728_v35  ;;  %v1870_v35 = vpack.c.bf16 %v1017_v33, %v1015_v32  ;;  %v1034_v32 = vld [vmem:[#allocation8 + $0xa0] sm:$0xff]  ;;  %v1036_v33 = vld [vmem:[#allocation8 + $0xb0] sm:$0xff]  ;;  %v1065_v29 = vld [vmem:[#allocation8 + $0x198] sm:$0xff] }
  0xee   :  { %1731 = vmatprep.subr.bf16.mxu1 %v1730_v36  ;;  %v1014_v36 = vld [vmem:[#allocation8] sm:$0xff] }
  0xef   :  { %1871 = vmatprep.subr.bf16.mxu0 %v1870_v35  ;;  %v366_v35 = vld [vmem:[#allocation6 + $0x950] sm:$0xff] }
  0xf1   :  { %1733 = vmatpush1.bf16.msra.mxu1 %v1732_v42  ;;  %v1872_v42 = vpack.c.bf16 %v1016_v37, %v1014_v36  ;;  %v378_v36 = vld [vmem:[#allocation6 + $0x9b0] sm:$0xff]  ;;  %v1892_v37 = vpack.c.bf16 %v1036_v33, %v1034_v32  ;;  %v2160_v32 = vld [vmem:[#allocation3 + $0x18] sm:$0xff]  ;;  %v1918_v33 = vpack.c.bf16 %v1065_v29, %v1063_v28  ;;  %v1158_v29 = vld [vmem:[#allocation8 + $0x480] sm:$0xff] }
  0xf2   :  { %1735 = vmatprep.subr.bf16.mxu1 %v1734_v43  ;;  %v271_v43 = vld [vmem:[#allocation6 + $0x658] sm:$0xff] }
  0xf3   :  { %1873 = vmatpush1.bf16.msra.mxu0 %v1872_v42  ;;  %v1838_v50 = vpack.c.bf16 %v283_v44, %v271_v43  ;;  %v1041_v42 = vld [vmem:[#allocation8 + $0xd8] sm:$0xff]  ;;  %v1856_v43 = vpack.c.bf16 %v378_v36, %v366_v35  ;;  %v1064_v35 = vld [vmem:[#allocation8 + $0x190] sm:$0xff]  ;;  %v1067_v36 = vld [vmem:[#allocation8 + $0x1a8] sm:$0xff] }
  0xf4   :  { %v1894_v44 = vpack.c.bf16 %v1041_v42, %v1039_v41  ;;  %v1066_v42 = vld [vmem:[#allocation8 + $0x1a0] sm:$0xff]  ;;  %v1161_v28 = vld [vmem:[#allocation8 + $0x498] sm:$0xff] }
  0xf5   :  { %1737 = vmatpush1.bf16.msra.mxu1 %v1736_v48  ;;  %v1874_v48 = vpack.c.bf16 %v1021_v46, %v1019_v45  ;;  %v1038_v45 = vld [vmem:[#allocation8 + $0xc0] sm:$0xff]  ;;  %v1040_v46 = vld [vmem:[#allocation8 + $0xd0] sm:$0xff] }
  0xf6   :  { %1739 = vmatprep.subr.bf16.mxu1 %v1738_v38  ;;  %v1018_v38 = vld [vmem:[#allocation8 + $0x20] sm:$0xff] }
  0xf7   :  { %1875 = vmatprep.subr.bf16.mxu0 %v1874_v48  ;;  %v390_v48 = vld [vmem:[#allocation6 + $0xa10] sm:$0xff] }
  0xf9   :  { %1741 = vmatpush1.bf16.msra.mxu1 %v1740_v53  ;;  %v1876_v53 = vpack.c.bf16 %v1020_v49, %v1018_v38  ;;  %v402_v38 = vld [vmem:[#allocation6 + $0xa70] sm:$0xff]  ;;  %v1896_v49 = vpack.c.bf16 %v1040_v46, %v1038_v45  ;;  %v1073_v45 = vld [vmem:[#allocation8 + $0x1d8] sm:$0xff] }
  0xfa   :  { %1807 = vmatprep.subr.bf16.mxu1 %v1806_v54  ;;  %v295_v54 = vld [vmem:[#allocation6 + $0x718] sm:$0xff] }
  0xfb   :  { %1877 = vmatpush1.bf16.msra.mxu0 %v1876_v53  ;;  %v1842_v62 = vpack.c.bf16 %v307_v55, %v295_v54  ;;  %v1045_v53 = vld [vmem:[#allocation8 + $0xf8] sm:$0xff]  ;;  %v1860_v54 = vpack.c.bf16 %v402_v38, %v390_v48  ;;  %v414_v55 = vld [vmem:[#allocation6 + $0xad0] sm:$0xff]  ;;  %v1070_v48 = vld [vmem:[#allocation8 + $0x1c0] sm:$0xff] }
  0xfc   :  { %748 = vmatmul.mubr.f32.vlgmr.msra.gmra.mrb[8].mxu1 %v2330_v2  ;;  %v162_v2 = vld [vmem:[#allocation6 + $0x2f0] sm:$0xff] }
  0xfd   :  { %1809 = vmatpush1.bf16.msra.mxu1 %v1808_v59  ;;  %753 = vmatprep.mubr.f32.mxu1 %v2332_v9  ;;  %v1820_v9 = vpack.c.bf16 %v162_v2, %v150_v12  ;;  %v1878_v59 = vpack.c.bf16 %v1025_v57, %v1023_v56  ;;  %v318_v2 = vld [vmem:[#allocation6 + $0x7d0] sm:$0xff]  ;;  %v1898_v56 = vpack.c.bf16 %v1045_v53, %v1043_v52  ;;  %v1042_v57 = vld [vmem:[#allocation8 + $0xe0] sm:$0xff] }
  0xfe   :  { %1811 = vmatprep.subr.bf16.mxu1 %v1810_v60  ;;  %v1022_v60 = vld [vmem:[#allocation8 + $0x40] sm:$0xff]  ;;  %v1848_v18 = vpack.c.bf16 %v330_v13, %v318_v2  ;;  %v1052_v13 = vld [vmem:[#allocation8 + $0x130] sm:$0xff] }
  0xff   :  { %1879 = vmatprep.subr.bf16.mxu0 %v1878_v59  ;;  %v1050_v2 = vld [vmem:[#allocation8 + $0x120] sm:$0xff]  ;;  %v1072_v38 = vld [vmem:[#allocation8 + $0x1d0] sm:$0xff] }
 0x100   :  { %754 = vmatmul.mubr.f32.gmra.mrb[10].mxu1 %v2336_v19  ;;  %v1824_v19 = vpack.c.bf16 %v186_v17, %v174_v16  ;;  %v1031_v16 = vld [vmem:[#allocation8 + $0x88] sm:$0xff]  ;;  %v1033_v17 = vld [vmem:[#allocation8 + $0x98] sm:$0xff]  ;;  %v1074_v53 = vld [vmem:[#allocation8 + $0x1e0] sm:$0xff] }
 0x101   :  { %1813 = vmatpush1.bf16.msra.mxu1 %v1812_v1  ;;  %901 = vmatprep.mubr.f32.mxu1 %v2158_v10  ;;  %v1880_v1 = vpack.c.bf16 %v1024_v61, %v1022_v60  ;;  %v1026_v10 = vld [vmem:[#allocation8 + $0x60] sm:$0xff]  ;;  %v1886_v20 = vpack.c.bf16 %v1033_v17, %v1031_v16  ;;  %v426_v60 = vld [vmem:[#allocation6 + $0xb30] sm:$0xff]  ;;  %v439_v61 = vld [vmem:[#allocation6 + $0xb98] sm:$0xff]  ;;  %v1908_v17 = vpack.c.bf16 %v1052_v13, %v1050_v2 }
 0x102   :  { %1815 = vmatprep.subr.bf16.mxu1 %v1814_v3  ;;  %v319_v3 = vld [vmem:[#allocation6 + $0x7d8] sm:$0xff] }
 0x103   :  { %1881 = vmatpush1.bf16.msra.mxu0 %v1880_v1  ;;  %v1846_v12 = vpack.c.bf16 %v331_v4, %v319_v3  ;;  %v1049_v1 = vld [vmem:[#allocation8 + $0x118] sm:$0xff]  ;;  %v1046_v3 = vld [vmem:[#allocation8 + $0x100] sm:$0xff] }
 0x104   :  { %v1902_v4 = vpack.c.bf16 %v1049_v1, %v1047_v0  ;;  %v1057_v16 = vld [vmem:[#allocation8 + $0x158] sm:$0xff]  ;;  %v1142_v1 = vld [vmem:[#allocation8 + $0x400] sm:$0xff] }
 0x105   :  { %1817 = vmatpush1.bf16.msra.mxu1 %v1816_v8  ;;  %v1882_v8 = vpack.c.bf16 %v1029_v6, %v1027_v5  ;;  %v1048_v5 = vld [vmem:[#allocation8 + $0x110] sm:$0xff]  ;;  %v1051_v6 = vld [vmem:[#allocation8 + $0x128] sm:$0xff]  ;;  %v1145_v0 = vld [vmem:[#allocation8 + $0x418] sm:$0xff] }
 0x106   :  { %1819 = vmatprep.subr.bf16.mxu1 %v1818_v11  ;;  %v1028_v11 = vld [vmem:[#allocation8 + $0x70] sm:$0xff] }
 0x107   :  { %v1884_v14 = vpack.c.bf16 %v1028_v11, %v1026_v10  ;;  %1883 = vmatprep.subr.bf16.mxu0 %v1882_v8  ;;  %v1864_v8 = vpack.c.bf16 %v426_v60, %v414_v55  ;;  %v438_v10 = vld [vmem:[#allocation6 + $0xb90] sm:$0xff]  ;;  %v1904_v11 = vpack.c.bf16 %v1048_v5, %v1046_v3 }
 0x108   :  { %v1144_v3 = vld [vmem:[#allocation8 + $0x410] sm:$0xff] }
 0x109   :  { %1821 = vmatpush1.bf16.msra.mxu1 %v1820_v9  ;;  %v343_v9 = vld [vmem:[#allocation6 + $0x898] sm:$0xff]  ;;  %1885 = vmatpush1.bf16.msra.mxu0 %v1884_v14  ;;  %v2364_v5 = vpack.c.bf16 %v1144_v3, %v1142_v1 }
 0x10a   :  { %1823 = vmatprep.subr.bf16.mxu1 %v1822_v15  ;;  %v355_v15 = vld [vmem:[#allocation6 + $0x8f8] sm:$0xff]  ;;  %1887 = vmatprep.subr.bf16.mxu0 %v1886_v20 }
 0x10b   :  { %v1850_v22 = vpack.c.bf16 %v355_v15, %v343_v9  ;;  %v450_v9 = vld [vmem:[#allocation6 + $0xbf0] sm:$0xff]  ;;  %v1055_v15 = vld [vmem:[#allocation8 + $0x148] sm:$0xff] }
 0x10c   :  { %v1910_v20 = vpack.c.bf16 %v1057_v16, %v1055_v15  ;;  %v1151_v15 = vld [vmem:[#allocation8 + $0x448] sm:$0xff]  ;;  %v1153_v16 = vld [vmem:[#allocation8 + $0x458] sm:$0xff] }
 0x10d   :  { %1825 = vmatpush1.bf16.msra.mxu1 %v1824_v19  ;;  %v1030_v19 = vld [vmem:[#allocation8 + $0x80] sm:$0xff] }
 0x10e   :  { %1827 = vmatprep.subr.bf16.mxu1 %v1826_v21  ;;  %v1032_v21 = vld [vmem:[#allocation8 + $0x90] sm:$0xff] }
 0x10f   :  { %v1888_v25 = vpack.c.bf16 %v1032_v21, %v1030_v19  ;;  %v1054_v19 = vld [vmem:[#allocation8 + $0x140] sm:$0xff]  ;;  %v1056_v21 = vld [vmem:[#allocation8 + $0x150] sm:$0xff] }
 0x110   :  { %v1912_v24 = vpack.c.bf16 %v1056_v21, %v1054_v19  ;;  %v1155_v21 = vld [vmem:[#allocation8 + $0x468] sm:$0xff] }
 0x111   :  { %1829 = vmatpush1.bf16.msra.mxu1 %v1828_v26  ;;  %v367_v26 = vld [vmem:[#allocation6 + $0x958] sm:$0xff]  ;;  %1889 = vmatpush1.bf16.msra.mxu0 %v1888_v25 }
 0x112   :  { %1831 = vmatprep.subr.bf16.mxu1 %v1830_v27  ;;  %v379_v27 = vld [vmem:[#allocation6 + $0x9b8] sm:$0xff]  ;;  %1891 = vmatprep.subr.bf16.mxu0 %v1890_v31 }
 0x115   :  { %1833 = vmatpush1.bf16.msra.mxu1 %v1832_v34  ;;  %v1854_v34 = vpack.c.bf16 %v379_v27, %v367_v26  ;;  %1893 = vmatpush1.bf16.msra.mxu0 %v1892_v37  ;;  %v1058_v26 = vld [vmem:[#allocation8 + $0x160] sm:$0xff]  ;;  %v1060_v27 = vld [vmem:[#allocation8 + $0x170] sm:$0xff]  ;;  %v1069_v37 = vld [vmem:[#allocation8 + $0x1b8] sm:$0xff] }
 0x116   :  { %1835 = vmatprep.subr.bf16.mxu1 %v1834_v39  ;;  %v391_v39 = vld [vmem:[#allocation6 + $0xa18] sm:$0xff]  ;;  %1895 = vmatprep.subr.bf16.mxu0 %v1894_v44  ;;  %v1916_v31 = vpack.c.bf16 %v1060_v27, %v1058_v26  ;;  %v1922_v41 = vpack.c.bf16 %v1069_v37, %v1067_v36  ;;  %v1071_v44 = vld [vmem:[#allocation8 + $0x1c8] sm:$0xff]  ;;  %v1164_v36 = vld [vmem:[#allocation8 + $0x4b0] sm:$0xff] }
 0x117   :  { %v1159_v27 = vld [vmem:[#allocation8 + $0x488] sm:$0xff] }
 0x119   :  { %1837 = vmatpush1.bf16.msra.mxu1 %v1836_v47  ;;  %v1858_v47 = vpack.c.bf16 %v403_v40, %v391_v39  ;;  %1897 = vmatpush1.bf16.msra.mxu0 %v1896_v49  ;;  %v2161_v39 = vld [vmem:[#allocation3 + $0x10] sm:$0xff]  ;;  %v1928_v49 = vpack.c.bf16 %v1072_v38, %v1070_v48  ;;  %v1170_v48 = vld [vmem:[#allocation8 + $0x4e0] sm:$0xff] }
 0x11a   :  { %1839 = vmatprep.subr.bf16.mxu1 %v1838_v50  ;;  %v415_v50 = vld [vmem:[#allocation6 + $0xad8] sm:$0xff]  ;;  %1899 = vmatprep.subr.bf16.mxu0 %v1898_v56  ;;  %v1172_v38 = vld [vmem:[#allocation8 + $0x4f0] sm:$0xff] }
 0x11b   :  { %v1862_v59 = vpack.c.bf16 %v427_v51, %v415_v50  ;;  %v1075_v50 = vld [vmem:[#allocation8 + $0x1e8] sm:$0xff]  ;;  %v1077_v51 = vld [vmem:[#allocation8 + $0x1f8] sm:$0xff] }
 0x11c   :  { %v1930_v52 = vpack.c.bf16 %v1077_v51, %v1075_v50  ;;  %v2414_v50 = vpack.c.bf16 %v1172_v38, %v1170_v48  ;;  %v1175_v51 = vld [vmem:[#allocation8 + $0x508] sm:$0xff]  ;;  %v1201_v48 = vld [vmem:[#allocation8 + $0x5d8] sm:$0xff]  ;;  %v1198_v38 = vld [vmem:[#allocation8 + $0x5c0] sm:$0xff] }
 0x11d   :  { %1841 = vmatpush1.bf16.msra.mxu1 %v1840_v58  ;;  %v1044_v58 = vld [vmem:[#allocation8 + $0xf0] sm:$0xff] }
 0x11e   :  { %1843 = vmatprep.subr.bf16.mxu1 %v1842_v62  ;;  %v451_v62 = vld [vmem:[#allocation6 + $0xbf8] sm:$0xff]  ;;  %v1900_v63 = vpack.c.bf16 %v1044_v58, %v1042_v57  ;;  %v1079_v58 = vld [vmem:[#allocation8 + $0x208] sm:$0xff] }
 0x11f   :  { %v1866_v14 = vpack.c.bf16 %v451_v62, %v439_v61 }
 0x120   :  { %1901 = vmatpush1.bf16.msra.mxu0 %v1900_v63  ;;  %v1143_v63 = vld [vmem:[#allocation8 + $0x408] sm:$0xff] }
 0x121   :  { %1845 = vmatpush1.bf16.msra.mxu1 %v1844_v7  ;;  %v1053_v7 = vld [vmem:[#allocation8 + $0x138] sm:$0xff]  ;;  %1903 = vmatprep.subr.bf16.mxu0 %v1902_v4  ;;  %v2362_v4 = vpack.c.bf16 %v1145_v0, %v1143_v63  ;;  %v1178_v63 = vld [vmem:[#allocation8 + $0x520] sm:$0xff]  ;;  %v1180_v0 = vld [vmem:[#allocation8 + $0x530] sm:$0xff] }
 0x122   :  { %1847 = vmatprep.subr.bf16.mxu1 %v1846_v12  ;;  %v1906_v12 = vpack.c.bf16 %v1053_v7, %v1051_v6  ;;  %v2426_v3 = vpack.c.bf16 %v1180_v0, %v1178_v63  ;;  %v1203_v63 = vld [vmem:[#allocation8 + $0x5e8] sm:$0xff]  ;;  %v1205_v0 = vld [vmem:[#allocation8 + $0x5f8] sm:$0xff] }
 0x124   :  { %1905 = vmatpush1.bf16.msra.mxu0 %v1904_v11  ;;  %v1146_v11 = vld [vmem:[#allocation8 + $0x420] sm:$0xff] }
 0x125   :  { %1849 = vmatpush1.bf16.msra.mxu1 %v1848_v18  ;;  %v1868_v18 = vpack.c.bf16 %v450_v9, %v438_v10  ;;  %1907 = vmatprep.subr.bf16.mxu0 %v1906_v12  ;;  %v1149_v10 = vld [vmem:[#allocation8 + $0x438] sm:$0xff]  ;;  %v1148_v12 = vld [vmem:[#allocation8 + $0x430] sm:$0xff] }
 0x126   :  { %1851 = vmatprep.subr.bf16.mxu1 %v1850_v22  ;;  %v1059_v22 = vld [vmem:[#allocation8 + $0x168] sm:$0xff]  ;;  %v2374_v13 = vpack.c.bf16 %v1148_v12, %v1146_v11  ;;  %v1182_v11 = vld [vmem:[#allocation8 + $0x540] sm:$0xff]  ;;  %v1184_v12 = vld [vmem:[#allocation8 + $0x550] sm:$0xff] }
 0x127   :  { %v1914_v25 = vpack.c.bf16 %v1061_v23, %v1059_v22  ;;  %v1157_v22 = vld [vmem:[#allocation8 + $0x478] sm:$0xff]  ;;  %v1154_v23 = vld [vmem:[#allocation8 + $0x460] sm:$0xff] }
 0x128   :  { %1909 = vmatpush1.bf16.msra.mxu0 %v1908_v17  ;;  %v1150_v17 = vld [vmem:[#allocation8 + $0x440] sm:$0xff] }
 0x129   :  { %1853 = vmatpush1.bf16.msra.mxu1 %v1852_v30  ;;  %1911 = vmatprep.subr.bf16.mxu0 %v1910_v20  ;;  %v2159_v30 = vld [vmem:[#allocation3] sm:$0xff]  ;;  %v1152_v20 = vld [vmem:[#allocation8 + $0x450] sm:$0xff] }
 0x12a   :  { %1855 = vmatprep.subr.bf16.mxu1 %v1854_v34  ;;  %v1062_v34 = vld [vmem:[#allocation8 + $0x180] sm:$0xff]  ;;  %v2384_v19 = vpack.c.bf16 %v1152_v20, %v1150_v17  ;;  %v1187_v17 = vld [vmem:[#allocation8 + $0x568] sm:$0xff]  ;;  %v1189_v20 = vld [vmem:[#allocation8 + $0x578] sm:$0xff] }
 0x12b   :  { %v1920_v40 = vpack.c.bf16 %v1064_v35, %v1062_v34  ;;  %v1165_v34 = vld [vmem:[#allocation8 + $0x4b8] sm:$0xff]  ;;  %v1162_v35 = vld [vmem:[#allocation8 + $0x4a0] sm:$0xff] }
 0x12c   :  { %1913 = vmatpush1.bf16.msra.mxu0 %v1912_v24  ;;  %v1156_v24 = vld [vmem:[#allocation8 + $0x470] sm:$0xff] }
 0x12d   :  { %1857 = vmatpush1.bf16.msra.mxu1 %v1856_v43  ;;  %1915 = vmatprep.subr.bf16.mxu0 %v1914_v25  ;;  %v1068_v43 = vld [vmem:[#allocation8 + $0x1b0] sm:$0xff]  ;;  %v2388_v25 = vpack.c.bf16 %v1157_v22, %v1155_v21  ;;  %v2390_v26 = vpack.c.bf16 %v1156_v24, %v1154_v23  ;;  %v1186_v21 = vld [vmem:[#allocation8 + $0x560] sm:$0xff]  ;;  %v2436_v23 = vpack.c.bf16 %v1189_v20, %v1187_v17 }
 0x12e   :  { %1859 = vmatprep.subr.bf16.mxu1 %v1858_v47  ;;  %v1924_v46 = vpack.c.bf16 %v1068_v43, %v1066_v42  ;;  %v1926_v47 = vpack.c.bf16 %v1073_v45, %v1071_v44  ;;  %v1166_v42 = vld [vmem:[#allocation8 + $0x4c0] sm:$0xff]  ;;  %v1168_v43 = vld [vmem:[#allocation8 + $0x4d0] sm:$0xff] }
 0x12f   :  { %v2408_v45 = vpack.c.bf16 %v1168_v43, %v1166_v42  ;;  %v1188_v22 = vld [vmem:[#allocation8 + $0x570] sm:$0xff] }
 0x130   :  { %1917 = vmatpush1.bf16.msra.mxu0 %v1916_v31  ;;  %v2394_v31 = vpack.c.bf16 %v1161_v28, %v1159_v27  ;;  %v2438_v24 = vpack.c.bf16 %v1188_v22, %v1186_v21  ;;  %v1191_v27 = vld [vmem:[#allocation8 + $0x588] sm:$0xff]  ;;  %v1193_v28 = vld [vmem:[#allocation8 + $0x598] sm:$0xff] }
 0x131   :  { %1861 = vmatpush1.bf16.msra.mxu1 %v1860_v54  ;;  %1919 = vmatprep.subr.bf16.mxu0 %v1918_v33  ;;  %v1076_v54 = vld [vmem:[#allocation8 + $0x1f0] sm:$0xff]  ;;  %v1163_v33 = vld [vmem:[#allocation8 + $0x4a8] sm:$0xff] }
 0x132   :  { %1863 = vmatprep.subr.bf16.mxu1 %v1862_v59  ;;  %v1932_v55 = vpack.c.bf16 %v1076_v54, %v1074_v53  ;;  %v1081_v59 = vld [vmem:[#allocation8 + $0x218] sm:$0xff]  ;;  %v2400_v37 = vpack.c.bf16 %v1165_v34, %v1163_v33  ;;  %v1174_v53 = vld [vmem:[#allocation8 + $0x500] sm:$0xff]  ;;  %v1176_v54 = vld [vmem:[#allocation8 + $0x510] sm:$0xff]  ;;  %v2442_v33 = vpack.c.bf16 %v1193_v28, %v1191_v27 }
 0x133   :  { %v1934_v60 = vpack.c.bf16 %v1081_v59, %v1079_v58  ;;  %v2420_v58 = vpack.c.bf16 %v1176_v54, %v1174_v53  ;;  %v1179_v59 = vld [vmem:[#allocation8 + $0x528] sm:$0xff] }
 0x134   :  { %1921 = vmatpush1.bf16.msra.mxu0 %v1920_v40  ;;  %v1167_v40 = vld [vmem:[#allocation8 + $0x4c8] sm:$0xff] }
 0x135   :  { %1865 = vmatpush1.bf16.msra.mxu1 %v1864_v8  ;;  %1923 = vmatprep.subr.bf16.mxu0 %v1922_v41  ;;  %v1147_v8 = vld [vmem:[#allocation8 + $0x428] sm:$0xff]  ;;  %v1169_v41 = vld [vmem:[#allocation8 + $0x4d8] sm:$0xff] }
 0x136   :  { %1867 = vmatprep.subr.bf16.mxu1 %v1866_v14  ;;  %v2372_v2 = vpack.c.bf16 %v1149_v10, %v1147_v8  ;;  %v2406_v44 = vpack.c.bf16 %v1169_v41, %v1167_v40  ;;  %v1183_v8 = vld [vmem:[#allocation8 + $0x548] sm:$0xff]  ;;  %v1185_v10 = vld [vmem:[#allocation8 + $0x558] sm:$0xff]  ;;  %v1194_v40 = vld [vmem:[#allocation8 + $0x5a0] sm:$0xff] }
 0x137   :  { %v1196_v41 = vld [vmem:[#allocation8 + $0x5b0] sm:$0xff] }
 0x138   :  { %1925 = vmatpush1.bf16.msra.mxu0 %v1924_v46  ;;  %v1171_v46 = vld [vmem:[#allocation8 + $0x4e8] sm:$0xff]  ;;  %v2450_v43 = vpack.c.bf16 %v1196_v41, %v1194_v40 }
 0x139   :  { %1869 = vmatpush1.bf16.msra.mxu1 %v1868_v18  ;;  %1927 = vmatprep.subr.bf16.mxu0 %v1926_v47  ;;  %v2382_v18 = vpack.c.bf16 %v1153_v16, %v1151_v15  ;;  %v1173_v47 = vld [vmem:[#allocation8 + $0x4f8] sm:$0xff]  ;;  %v2430_v15 = vpack.c.bf16 %v1185_v10, %v1183_v8  ;;  %v2432_v16 = vpack.c.bf16 %v1184_v12, %v1182_v11  ;;  %v1202_v11 = vld [vmem:[#allocation8 + $0x5e0] sm:$0xff]  ;;  %v1204_v12 = vld [vmem:[#allocation8 + $0x5f0] sm:$0xff] }
 0x13a   :  { %2062 = vmatprep.subr.bf16.mxu1 %v2362_v4  ;;  %v2460_v10 = vpack.c.bf16 %v1205_v0, %v1203_v63  ;;  %v2462_v21 = vpack.c.bf16 %v1204_v12, %v1202_v11 }
 0x13c   :  { %902 = vmatmul.mubr.f32.vlgmr.msra.gmra.mrb[12].mxu1 %v2159_v30  ;;  %1929 = vmatpush1.bf16.msra.mxu0 %v1928_v49  ;;  %v1160_v30 = vld [vmem:[#allocation8 + $0x490] sm:$0xff]  ;;  %v2412_v49 = vpack.c.bf16 %v1173_v47, %v1171_v46  ;;  %v1199_v46 = vld [vmem:[#allocation8 + $0x5c8] sm:$0xff]  ;;  %2544 = vst [vmem:[#allocation13_spill] sm:$0xff] %v2460_v10  ;;  %2545 = vst [vmem:[#allocation14_spill] sm:$0xff] %v2462_v21 }
 0x13d   :  { %907 = vmatprep.mubr.f32.mxu1 %v2160_v32  ;;  %1931 = vmatprep.subr.bf16.mxu0 %v1930_v52  ;;  %v2396_v32 = vpack.c.bf16 %v1160_v30, %v1158_v29  ;;  %v1177_v52 = vld [vmem:[#allocation8 + $0x518] sm:$0xff]  ;;  %v1190_v29 = vld [vmem:[#allocation8 + $0x580] sm:$0xff]  ;;  %v1192_v30 = vld [vmem:[#allocation8 + $0x590] sm:$0xff]  ;;  %v2454_v54 = vpack.c.bf16 %v1201_v48, %v1199_v46 }
 0x13e   :  { %2078 = vmatpush1.bf16.msra.mxu1 %v2364_v5  ;;  %v2444_v34 = vpack.c.bf16 %v1192_v30, %v1190_v29 }
 0x13f   :  { %2063 = vmatprep.subr.bf16.mxu1 %v2372_v2 }
 0x140   :  { %908 = vmatmul.mubr.f32.gmra.mrb[14].mxu1 %v2161_v39  ;;  %1933 = vmatpush1.bf16.msra.mxu0 %v1932_v55  ;;  %v2402_v39 = vpack.c.bf16 %v1164_v36, %v1162_v35  ;;  %v2418_v55 = vpack.c.bf16 %v1177_v52, %v1175_v51  ;;  %v1195_v35 = vld [vmem:[#allocation8 + $0x5a8] sm:$0xff]  ;;  %v1197_v36 = vld [vmem:[#allocation8 + $0x5b8] sm:$0xff]  ;;  %v1200_v51 = vld [vmem:[#allocation8 + $0x5d0] sm:$0xff] }
 0x141   :  { %1935 = vmatprep.subr.bf16.mxu0 %v1934_v60  ;;  %v1181_v60 = vld [vmem:[#allocation8 + $0x538] sm:$0xff]  ;;  %v2448_v42 = vpack.c.bf16 %v1197_v36, %v1195_v35 }
 0x142   :  { %2079 = vmatpush1.bf16.msra.mxu1 %v2374_v13  ;;  %v2424_v1 = vpack.c.bf16 %v1181_v60, %v1179_v59  ;;  %v2456_v59 = vpack.c.bf16 %v1200_v51, %v1198_v38 }
 0x143   :  { %2064 = vmatprep.subr.bf16.mxu1 %v2382_v18 }
 0x146   :  { %2080 = vmatpush1.bf16.msra.mxu1 %v2384_v19 }
 0x147   :  { %2065 = vmatprep.subr.bf16.mxu1 %v2388_v25 }
 0x14a   :  { %2081 = vmatpush1.bf16.msra.mxu1 %v2390_v26 }
 0x14b   :  { %2066 = vmatprep.subr.bf16.mxu1 %v2394_v31 }
 0x14e   :  { %2082 = vmatpush1.bf16.msra.mxu1 %v2396_v32 }
 0x14f   :  { %v2354_v56 = vpop.f32.mrb[0].mxu1  ;;  %2067 = vmatprep.subr.bf16.mxu1 %v2400_v37 }
 0x150   :  { %v2356_v57 = vpop.f32.mrb[1].mxu1  ;;  %v1474_v11 = vmul.f32 -1.442695, %v2354_v56 }
 0x152   :  { %2083 = vmatpush1.bf16.msra.mxu1 %v2402_v39 }
 0x153   :  { %v2358_v61 = vpop.f32.mrb[2].mxu1  ;;  %2068 = vmatprep.subr.bf16.mxu1 %v2406_v44 }
 0x154   :  { %v2360_v62 = vpop.f32.mrb[3].mxu1 }
 0x156   :  { %2084 = vmatpush1.bf16.msra.mxu1 %v2408_v45 }
 0x157   :  { %2069 = vmatprep.subr.bf16.mxu1 %v2412_v49 }
 0x158   :  { %v2366_v6 = vpop.f32.mrb[0].mxu0 }
 0x159   :  { %v2368_v7 = vpop.f32.mrb[1].mxu0 }
 0x15a   :  { %2085 = vmatpush1.bf16.msra.mxu1 %v2414_v50 }
 0x15b   :  { %2070 = vmatprep.subr.bf16.mxu1 %v2418_v55 }
 0x15c   :  { %v2376_v14 = vpop.f32.mrb[2].mxu0 }
 0x15d   :  { %v2378_v9 = vpop.f32.mrb[3].mxu0 }
 0x15e   :  { %2086 = vmatpush1.bf16.msra.mxu1 %v2420_v58 }
 0x15f   :  { %2071 = vmatprep.subr.bf16.mxu1 %v2424_v1 }
 0x162   :  { %2087 = vmatpush1.bf16.msra.mxu1 %v2426_v3 }
 0x163   :  { %2072 = vmatprep.subr.bf16.mxu1 %v2430_v15 }
 0x166   :  { %2088 = vmatpush1.bf16.msra.mxu1 %v2432_v16 }
 0x167   :  { %2073 = vmatprep.subr.bf16.mxu1 %v2436_v23 }
 0x16a   :  { %2089 = vmatpush1.bf16.msra.mxu1 %v2438_v24 }
 0x16b   :  { %2074 = vmatprep.subr.bf16.mxu1 %v2442_v33 }
 0x16e   :  { %2090 = vmatpush1.bf16.msra.mxu1 %v2444_v34 }
 0x16f   :  { %2075 = vmatprep.subr.bf16.mxu1 %v2448_v42 }
 0x172   :  { %2091 = vmatpush1.bf16.msra.mxu1 %v2450_v43 }
 0x173   :  { %2076 = vmatprep.subr.bf16.mxu1 %v2454_v54 }
 0x176   :  { %2092 = vmatpush1.bf16.msra.mxu1 %v2456_v59 }
 0x177   :  { %2077 = vmatprep.subr.bf16.mxu1 %v2460_v10 }
 0x17a   :  { %2093 = vmatpush1.bf16.msra.mxu1 %v2462_v21  ;;  %v1089_v21 = vld [vmem:[#allocation8 + $0x258] sm:$0xff] }
 0x18f   :  { %v595_v47 = vpop.f32.mrb[4].mxu1 }
 0x190   :  { %v1476_v52 = vmul.f32 -1.442695, %v595_v47  ;;  %v597_v53 = vpop.f32.mrb[5].mxu1 }
 0x191   :  { %v1477_v60 = vmul.f32 -1.442695, %v597_v53 }
 0x192   :  { %2110 = vpow2.f32 %v1476_v52 }
 0x193   :  { %2112 = vpow2.f32 %v1477_v60  ;;  %v601_v8 = vpop.f32.mrb[6].mxu1 }
 0x194   :  { %v1482_v17 = vmul.f32 -1.442695, %v601_v8  ;;  %v603_v20 = vpop.f32.mrb[7].mxu1 }
 0x195   :  { %v1483_v22 = vmul.f32 -1.442695, %v603_v20 }
 0x196   :  { %2114 = vpow2.f32 %v1482_v17 }
 0x197   :  { %2116 = vpow2.f32 %v1483_v22  ;;  %v1475_v22 = vmul.f32 -1.442695, %v2356_v57 }
 0x198   :  { %v826_v27 = vpop.f32.mrb[4].mxu0 }
 0x199   :  { %v828_v28 = vpop.f32.mrb[5].mxu0 }
 0x19c   :  { %v2111_v29 = vpop.eup %2110  ;;  %v832_v36 = vpop.f32.mrb[6].mxu0 }
 0x19d   :  { %v2113_v30 = vpop.eup %2112  ;;  %v952_v35 = vadd.f32 1.0, %v2111_v29  ;;  %v834_v41 = vpop.f32.mrb[7].mxu0 }
 0x19e   :  { %v953_v40 = vadd.f32 1.0, %v2113_v30 }
 0x19f   :  { %2118 = vrcp.f32 %v952_v35 }
 0x1a0   :  { %v2115_v46 = vpop.eup %2114  ;;  %2120 = vrcp.f32 %v953_v40 }
 0x1a1   :  { %v2117_v48 = vpop.eup %2116  ;;  %v958_v38 = vadd.f32 1.0, %v2115_v46  ;;  %v1480_v46 = vmul.f32 -1.442695, %v2358_v61 }
 0x1a2   :  { %v959_v51 = vadd.f32 1.0, %v2117_v48 }
 0x1a3   :  { %2122 = vrcp.f32 %v958_v38 }
 0x1a4   :  { %2124 = vrcp.f32 %v959_v51 }
 0x1a5   :  { %2126 = vpow2.f32 %v1474_v11  ;;  %v1080_v11 = vld [vmem:[#allocation8 + $0x210] sm:$0xff] }
 0x1a6   :  { %2128 = vpow2.f32 %v1475_v22 }
 0x1a7   :  { %2130 = vpow2.f32 %v1480_v46 }
 0x1a9   :  { %v2119_v52 = vpop.eup %2118 }
 0x1aa   :  { %v2121_v60 = vpop.eup %2120  ;;  %v988_v63 = vmul.f32 %v2119_v52, %v595_v47  ;;  %v1481_v47 = vmul.f32 -1.442695, %v2360_v62 }
 0x1ab   :  { %v989_v0 = vmul.f32 %v2121_v60, %v597_v53 }
 0x1ac   :  { %v2467_v12 = vmul.f32 %v988_v63, %v826_v27  ;;  %2132 = vpow2.f32 %v1481_v47 }
 0x1ad   :  { %v2123_v17 = vpop.eup %2122  ;;  %v1001_v29 = vmul.f32 %v989_v0, %v828_v28 }
 0x1ae   :  { %v2125_v30 = vpop.eup %2124  ;;  %v994_v35 = vmul.f32 %v2123_v17, %v601_v8 }
 0x1af   :  { %v995_v40 = vmul.f32 %v2125_v30, %v603_v20  ;;  %v2127_v27 = vpop.eup %2126 }
 0x1b0   :  { %v2471_v48 = vmul.f32 %v994_v35, %v832_v36  ;;  %v2129_v38 = vpop.eup %2128  ;;  %v950_v51 = vadd.f32 1.0, %v2127_v27  ;;  %v1083_v35 = vld [vmem:[#allocation8 + $0x228] sm:$0xff] }
 0x1b1   :  { %v2474_v53 = vmul.f32 %v995_v40, %v834_v41  ;;  %v2131_v52 = vpop.eup %2130  ;;  %v951_v28 = vadd.f32 1.0, %v2129_v38  ;;  %v1078_v41 = vld [vmem:[#allocation8 + $0x200] sm:$0xff]  ;;  %v1085_v40 = vld [vmem:[#allocation8 + $0x238] sm:$0xff] }
 0x1b2   :  { %2134 = vrcp.f32 %v950_v51  ;;  %v956_v8 = vadd.f32 1.0, %v2131_v52  ;;  %v1936_v51 = vpack.c.bf16 %v1080_v11, %v1078_v41  ;;  %v1086_v41 = vld [vmem:[#allocation8 + $0x240] sm:$0xff]  ;;  %v1088_v11 = vld [vmem:[#allocation8 + $0x250] sm:$0xff] }
 0x1b3   :  { %2136 = vrcp.f32 %v951_v28  ;;  %v1938_v28 = vpack.c.bf16 %v1085_v40, %v1083_v35  ;;  %v1090_v35 = vld [vmem:[#allocation8 + $0x260] sm:$0xff]  ;;  %v1092_v40 = vld [vmem:[#allocation8 + $0x270] sm:$0xff] }
 0x1b4   :  { %2138 = vrcp.f32 %v956_v8  ;;  %v1084_v8 = vld [vmem:[#allocation8 + $0x230] sm:$0xff] }
 0x1b6   :  { %v2133_v60 = vpop.eup %2132 }
 0x1b7   :  { %v957_v20 = vadd.f32 1.0, %v2133_v60  ;;  %v1082_v60 = vld [vmem:[#allocation8 + $0x220] sm:$0xff] }
 0x1b9   :  { %2140 = vrcp.f32 %v957_v20 }
 0x1bc   :  { %v2135_v36 = vpop.eup %2134 }
 0x1bd   :  { %v2137_v63 = vpop.eup %2136  ;;  %v986_v0 = vmul.f32 %v2135_v36, %v2354_v56  ;;  %v1087_v36 = vld [vmem:[#allocation8 + $0x248] sm:$0xff] }
 0x1be   :  { %v2139_v17 = vpop.eup %2138  ;;  %v987_v22 = vmul.f32 %v2137_v63, %v2356_v57 }
 0x1bf   :  { %v992_v52 = vmul.f32 %v2139_v17, %v2358_v61  ;;  %v1091_v61 = vld [vmem:[#allocation8 + $0x268] sm:$0xff]  ;;  %v1093_v17 = vld [vmem:[#allocation8 + $0x278] sm:$0xff] }
 0x1c3   :  { %v2141_v46 = vpop.eup %2140 }
 0x1c4   :  { %v993_v56 = vmul.f32 %v2141_v46, %v2360_v62  ;;  %v1944_v62 = vpack.c.bf16 %v1088_v11, %v1086_v41  ;;  %v1095_v46 = vld [vmem:[#allocation8 + $0x288] sm:$0xff]  ;;  %v1109_v41 = vld [vmem:[#allocation8 + $0x2f8] sm:$0xff] }
 0x1cf   :  { %v749_v30 = vpop.f32.mrb[8].mxu1 }
 0x1d0   :  { %v998_v47 = vmul.f32 %v986_v0, %v749_v30  ;;  %v751_v27 = vpop.f32.mrb[9].mxu1  ;;  %v1940_v0 = vpack.c.bf16 %v1084_v8, %v1082_v60  ;;  %v1946_v30 = vpack.c.bf16 %v1093_v17, %v1091_v61  ;;  %v1100_v8 = vld [vmem:[#allocation8 + $0x2b0] sm:$0xff]  ;;  %v1106_v17 = vld [vmem:[#allocation8 + $0x2e0] sm:$0xff] }
 0x1d1   :  { %v999_v38 = vmul.f32 %v987_v22, %v751_v27  ;;  %v1942_v22 = vpack.c.bf16 %v1089_v21, %v1087_v36  ;;  %v1948_v27 = vpack.c.bf16 %v1092_v40, %v1090_v35  ;;  %v1094_v21 = vld [vmem:[#allocation8 + $0x280] sm:$0xff]  ;;  %v1113_v35 = vld [vmem:[#allocation8 + $0x318] sm:$0xff]  ;;  %v1478_v40 = vmul.f32 -1.442695, %v2366_v6 }
 0x1d3   :  { %v755_v20 = vpop.f32.mrb[10].mxu1  ;;  %1270 = vmatprep.mubr.f32.mxu0 %v999_v38  ;;  %2142 = vpow2.f32 %v1478_v40 }
 0x1d4   :  { %v1004_v57 = vmul.f32 %v992_v52, %v755_v20  ;;  %v757_v63 = vpop.f32.mrb[11].mxu1  ;;  %1271 = vmatmul.mubr.f32.vlgmr.msra.gmra.mrb[8].mxu0 %v998_v47  ;;  %v1097_v47 = vld [vmem:[#allocation8 + $0x298] sm:$0xff]  ;;  %v1099_v52 = vld [vmem:[#allocation8 + $0x2a8] sm:$0xff] }
 0x1d5   :  { %v1005_v10 = vmul.f32 %v993_v56, %v757_v63  ;;  %1937 = vmatpush1.bf16.msra.mxu0 %v1936_v51  ;;  %v1950_v38 = vpack.c.bf16 %v1097_v47, %v1095_v46  ;;  %v1096_v51 = vld [vmem:[#allocation8 + $0x290] sm:$0xff]  ;;  %v1103_v56 = vld [vmem:[#allocation8 + $0x2c8] sm:$0xff]  ;;  %v1105_v20 = vld [vmem:[#allocation8 + $0x2d8] sm:$0xff]  ;;  %v1479_v46 = vmul.f32 -1.442695, %v2368_v7 }
 0x1d6   :  { %1939 = vmatprep.subr.bf16.mxu0 %v1938_v28  ;;  %v1952_v28 = vpack.c.bf16 %v1096_v51, %v1094_v21  ;;  %v1102_v63 = vld [vmem:[#allocation8 + $0x2c0] sm:$0xff]  ;;  %v1112_v21 = vld [vmem:[#allocation8 + $0x310] sm:$0xff]  ;;  %v1115_v51 = vld [vmem:[#allocation8 + $0x328] sm:$0xff] }
 0x1d7   :  { %1276 = vmatprep.mubr.f32.mxu0 %v1005_v10  ;;  %v1101_v10 = vld [vmem:[#allocation8 + $0x2b8] sm:$0xff]  ;;  %2144 = vpow2.f32 %v1479_v46  ;;  %v1127_v46 = vld [vmem:[#allocation8 + $0x388] sm:$0xff] }
 0x1d8   :  { %1277 = vmatmul.mubr.f32.gmra.mrb[10].mxu0 %v1004_v57  ;;  %v1954_v60 = vpack.c.bf16 %v1101_v10, %v1099_v52  ;;  %v1958_v57 = vpack.c.bf16 %v1105_v20, %v1103_v56  ;;  %v1117_v52 = vld [vmem:[#allocation8 + $0x338] sm:$0xff]  ;;  %v1484_v10 = vmul.f32 -1.442695, %v2376_v14  ;;  %v1116_v56 = vld [vmem:[#allocation8 + $0x330] sm:$0xff]  ;;  %v1119_v20 = vld [vmem:[#allocation8 + $0x348] sm:$0xff] }
 0x1d9   :  { %1941 = vmatpush1.bf16.msra.mxu0 %v1940_v0  ;;  %1347 = vmatprep.mubr.f32.mxu0 %v1001_v29  ;;  %v1098_v29 = vld [vmem:[#allocation8 + $0x2a0] sm:$0xff]  ;;  %v1104_v0 = vld [vmem:[#allocation8 + $0x2d0] sm:$0xff] }
 0x1da   :  { %1943 = vmatprep.subr.bf16.mxu0 %v1942_v22  ;;  %v1956_v36 = vpack.c.bf16 %v1100_v8, %v1098_v29  ;;  %v1107_v22 = vld [vmem:[#allocation8 + $0x2e8] sm:$0xff]  ;;  %v1960_v11 = vpack.c.bf16 %v1104_v0, %v1102_v63  ;;  %v1970_v29 = vpack.c.bf16 %v1117_v52, %v1115_v51  ;;  %v1114_v8 = vld [vmem:[#allocation8 + $0x320] sm:$0xff]  ;;  %2146 = vpow2.f32 %v1484_v10 }
 0x1db   :  { %v1962_v61 = vpack.c.bf16 %v1109_v41, %v1107_v22  ;;  %v1118_v0 = vld [vmem:[#allocation8 + $0x340] sm:$0xff]  ;;  %v1120_v22 = vld [vmem:[#allocation8 + $0x350] sm:$0xff]  ;;  %v1123_v41 = vld [vmem:[#allocation8 + $0x368] sm:$0xff] }
 0x1dc   :  { %v1126_v10 = vld [vmem:[#allocation8 + $0x380] sm:$0xff] }
 0x1dd   :  { %1945 = vmatpush1.bf16.msra.mxu0 %v1944_v62  ;;  %v1108_v62 = vld [vmem:[#allocation8 + $0x2f0] sm:$0xff] }
 0x1de   :  { %1947 = vmatprep.subr.bf16.mxu0 %v1946_v30  ;;  %v1111_v30 = vld [vmem:[#allocation8 + $0x308] sm:$0xff]  ;;  %v1964_v47 = vpack.c.bf16 %v1108_v62, %v1106_v17  ;;  %v2143_v17 = vpop.eup %2142 }
 0x1e1   :  { %1949 = vmatpush1.bf16.msra.mxu0 %v1948_v27  ;;  %v1966_v27 = vpack.c.bf16 %v1113_v35, %v1111_v30  ;;  %v1122_v30 = vld [vmem:[#allocation8 + $0x360] sm:$0xff]  ;;  %v1124_v35 = vld [vmem:[#allocation8 + $0x370] sm:$0xff]  ;;  %v2145_v40 = vpop.eup %2144 }
 0x1e2   :  { %1951 = vmatprep.subr.bf16.mxu0 %v1950_v38  ;;  %v1110_v38 = vld [vmem:[#allocation8 + $0x300] sm:$0xff]  ;;  %v955_v51 = vadd.f32 1.0, %v2145_v40 }
 0x1e5   :  { %1953 = vmatpush1.bf16.msra.mxu0 %v1952_v28  ;;  %v1485_v28 = vmul.f32 -1.442695, %v2378_v9 }
 0x1e6   :  { %1955 = vmatprep.subr.bf16.mxu0 %v1954_v60  ;;  %v1968_v60 = vpack.c.bf16 %v1112_v21, %v1110_v38  ;;  %v1980_v38 = vpack.c.bf16 %v1124_v35, %v1122_v30  ;;  %v2147_v21 = vpop.eup %2146  ;;  %v1139_v30 = vld [vmem:[#allocation8 + $0x3e8] sm:$0xff]  ;;  %v1141_v35 = vld [vmem:[#allocation8 + $0x3f8] sm:$0xff] }
 0x1e7   :  { %2148 = vpow2.f32 %v1485_v28  ;;  %v1128_v28 = vld [vmem:[#allocation8 + $0x390] sm:$0xff] }
 0x1e9   :  { %1957 = vmatpush1.bf16.msra.mxu0 %v1956_v36  ;;  %v1121_v36 = vld [vmem:[#allocation8 + $0x358] sm:$0xff] }
 0x1ea   :  { %1959 = vmatprep.subr.bf16.mxu0 %v1958_v57  ;;  %v1972_v57 = vpack.c.bf16 %v1116_v56, %v1114_v8  ;;  %v1974_v63 = vpack.c.bf16 %v1121_v36, %v1119_v20  ;;  %v1133_v8 = vld [vmem:[#allocation8 + $0x3b8] sm:$0xff]  ;;  %v960_v56 = vadd.f32 1.0, %v2147_v21  ;;  %v1984_v20 = vpack.c.bf16 %v1128_v28, %v1126_v10 }
 0x1ed   :  { %1961 = vmatpush1.bf16.msra.mxu0 %v1960_v11  ;;  %v1125_v11 = vld [vmem:[#allocation8 + $0x378] sm:$0xff] }
 0x1ee   :  { %1963 = vmatprep.subr.bf16.mxu0 %v1962_v61  ;;  %v1976_v61 = vpack.c.bf16 %v1120_v22, %v1118_v0  ;;  %v1978_v62 = vpack.c.bf16 %v1125_v11, %v1123_v41  ;;  %v1132_v0 = vld [vmem:[#allocation8 + $0x3b0] sm:$0xff]  ;;  %v1135_v22 = vld [vmem:[#allocation8 + $0x3c8] sm:$0xff]  ;;  %v1137_v41 = vld [vmem:[#allocation8 + $0x3d8] sm:$0xff] }
 0x1f1   :  { %1965 = vmatpush1.bf16.msra.mxu0 %v1964_v47  ;;  %v1129_v47 = vld [vmem:[#allocation8 + $0x398] sm:$0xff] }
 0x1f2   :  { %1967 = vmatprep.subr.bf16.mxu0 %v1966_v27  ;;  %v954_v27 = vadd.f32 1.0, %v2143_v17  ;;  %v1982_v52 = vpack.c.bf16 %v1129_v47, %v1127_v46  ;;  %v1134_v17 = vld [vmem:[#allocation8 + $0x3c0] sm:$0xff]  ;;  %v1994_v46 = vpack.c.bf16 %v1141_v35, %v1139_v30 }
 0x1f3   :  { %v1138_v47 = vld [vmem:[#allocation8 + $0x3e0] sm:$0xff] }
 0x1f4   :  { %2150 = vrcp.f32 %v954_v27  ;;  %v1140_v27 = vld [vmem:[#allocation8 + $0x3f0] sm:$0xff] }
 0x1f5   :  { %1969 = vmatpush1.bf16.msra.mxu0 %v1968_v60  ;;  %v2149_v60 = vpop.eup %2148  ;;  %2152 = vrcp.f32 %v955_v51  ;;  %v1996_v51 = vpack.c.bf16 %v1140_v27, %v1138_v47 }
 0x1f6   :  { %1971 = vmatprep.subr.bf16.mxu0 %v1970_v29  ;;  %v1131_v29 = vld [vmem:[#allocation8 + $0x3a8] sm:$0xff]  ;;  %v961_v36 = vadd.f32 1.0, %v2149_v60  ;;  %2154 = vrcp.f32 %v960_v56 }
 0x1f8   :  { %2156 = vrcp.f32 %v961_v36 }
 0x1f9   :  { %1973 = vmatpush1.bf16.msra.mxu0 %v1972_v57  ;;  %v1986_v57 = vpack.c.bf16 %v1133_v8, %v1131_v29 }
 0x1fa   :  { %1975 = vmatprep.subr.bf16.mxu0 %v1974_v63  ;;  %v1130_v63 = vld [vmem:[#allocation8 + $0x3a0] sm:$0xff] }
 0x1fb   :  { %v1988_v11 = vpack.c.bf16 %v1132_v0, %v1130_v63 }
 0x1fd   :  { %1977 = vmatpush1.bf16.msra.mxu0 %v1976_v61  ;;  %v1990_v61 = vpack.c.bf16 %v1137_v41, %v1135_v22 }
 0x1fe   :  { %1979 = vmatprep.subr.bf16.mxu0 %v1978_v62  ;;  %v1136_v62 = vld [vmem:[#allocation8 + $0x3d0] sm:$0xff] }
 0x1ff   :  { %v1992_v40 = vpack.c.bf16 %v1136_v62, %v1134_v17 }
 0x201   :  { %1981 = vmatpush1.bf16.msra.mxu0 %v1980_v38  ;;  %v2151_v38 = vpop.eup %2150 }
 0x202   :  { %1983 = vmatprep.subr.bf16.mxu0 %v1982_v52  ;;  %v2153_v21 = vpop.eup %2152  ;;  %v990_v52 = vmul.f32 %v2151_v38, %v2366_v6 }
 0x203   :  { %v2155_v10 = vpop.eup %2154  ;;  %v991_v28 = vmul.f32 %v2153_v21, %v2368_v7 }
 0x204   :  { %v2157_v29 = vpop.eup %2156  ;;  %v996_v36 = vmul.f32 %v2155_v10, %v2376_v14 }
 0x205   :  { %1985 = vmatpush1.bf16.msra.mxu0 %v1984_v20 }
 0x206   :  { %1987 = vmatprep.subr.bf16.mxu0 %v1986_v57  ;;  %v997_v57 = vmul.f32 %v2157_v29, %v2378_v9 }
 0x209   :  { %1989 = vmatpush1.bf16.msra.mxu0 %v1988_v11 }
 0x20a   :  { %1991 = vmatprep.subr.bf16.mxu0 %v1990_v61 }
 0x20d   :  { %1993 = vmatpush1.bf16.msra.mxu0 %v1992_v40 }
 0x20e   :  { %1995 = vmatprep.subr.bf16.mxu0 %v1994_v46 }
 0x20f   :  { %v903_v60 = vpop.f32.mrb[12].mxu1 }
 0x210   :  { %v1002_v8 = vmul.f32 %v990_v52, %v903_v60  ;;  %v905_v56 = vpop.f32.mrb[13].mxu1 }
 0x211   :  { %v1003_v20 = vmul.f32 %v991_v28, %v905_v56  ;;  %1997 = vmatpush1.bf16.msra.mxu0 %v1996_v51 }
 0x212   :  { %1999 = vmatprep.subr.bf16.mxu0 %v2362_v4  ;;  %v2546_v4 = vld [vmem:[#allocation13_spill] sm:$0xff] }
 0x213   :  { %v909_v63 = vpop.f32.mrb[14].mxu1 }
 0x214   :  { %v1008_v0 = vmul.f32 %v996_v36, %v909_v63  ;;  %1348 = vmatmul.mubr.f32.vlgmr.msra.gmra.mrb[8].mxu0 %v2467_v12  ;;  %v911_v6 = vpop.f32.mrb[15].mxu1 }
 0x215   :  { %v1009_v22 = vmul.f32 %v997_v57, %v911_v6  ;;  %1353 = vmatprep.mubr.f32.mxu0 %v2474_v53  ;;  %2001 = vmatpush1.bf16.msra.mxu0 %v2364_v5  ;;  %v2547_v5 = vld [vmem:[#allocation14_spill] sm:$0xff] }
 0x216   :  { %2003 = vmatprep.subr.bf16.mxu0 %v2372_v2 }
 0x217   :  { %1430 = vmatprep.mubr.f32.mxu1 %v1009_v22 }
 0x218   :  { %1354 = vmatmul.mubr.f32.gmra.mrb[10].mxu0 %v2471_v48  ;;  %1431 = vmatmul.mubr.f32.vlgmr.msra.gmra.mrb[16].mxu1 %v1008_v0 }
 0x219   :  { %2005 = vmatpush1.bf16.msra.mxu0 %v2374_v13  ;;  %1424 = vmatprep.mubr.f32.mxu0 %v1003_v20 }
 0x21a   :  { %2007 = vmatprep.subr.bf16.mxu0 %v2382_v18 }
 0x21d   :  { %2009 = vmatpush1.bf16.msra.mxu0 %v2384_v19 }
 0x21e   :  { %2011 = vmatprep.subr.bf16.mxu0 %v2388_v25 }
 0x221   :  { %2013 = vmatpush1.bf16.msra.mxu0 %v2390_v26 }
 0x222   :  { %2015 = vmatprep.subr.bf16.mxu0 %v2394_v31 }
 0x225   :  { %2017 = vmatpush1.bf16.msra.mxu0 %v2396_v32 }
 0x226   :  { %2019 = vmatprep.subr.bf16.mxu0 %v2400_v37 }
 0x229   :  { %2021 = vmatpush1.bf16.msra.mxu0 %v2402_v39 }
 0x22a   :  { %2023 = vmatprep.subr.bf16.mxu0 %v2406_v44 }
 0x22d   :  { %2025 = vmatpush1.bf16.msra.mxu0 %v2408_v45 }
 0x22e   :  { %2027 = vmatprep.subr.bf16.mxu0 %v2412_v49 }
 0x231   :  { %2029 = vmatpush1.bf16.msra.mxu0 %v2414_v50 }
 0x232   :  { %2031 = vmatprep.subr.bf16.mxu0 %v2418_v55 }
 0x235   :  { %2033 = vmatpush1.bf16.msra.mxu0 %v2420_v58 }
 0x236   :  { %2035 = vmatprep.subr.bf16.mxu0 %v2424_v1 }
 0x239   :  { %2037 = vmatpush1.bf16.msra.mxu0 %v2426_v3 }
 0x23a   :  { %2039 = vmatprep.subr.bf16.mxu0 %v2430_v15 }
 0x23d   :  { %2041 = vmatpush1.bf16.msra.mxu0 %v2432_v16 }
 0x23e   :  { %2043 = vmatprep.subr.bf16.mxu0 %v2436_v23 }
 0x241   :  { %2045 = vmatpush1.bf16.msra.mxu0 %v2438_v24 }
 0x242   :  { %2047 = vmatprep.subr.bf16.mxu0 %v2442_v33 }
 0x245   :  { %2049 = vmatpush1.bf16.msra.mxu0 %v2444_v34 }
 0x246   :  { %2051 = vmatprep.subr.bf16.mxu0 %v2448_v42 }
 0x249   :  { %2053 = vmatpush1.bf16.msra.mxu0 %v2450_v43 }
 0x24a   :  { %2055 = vmatprep.subr.bf16.mxu0 %v2454_v54 }
 0x24d   :  { %2057 = vmatpush1.bf16.msra.mxu0 %v2456_v59 }
 0x24e   :  { %2059 = vmatprep.subr.bf16.mxu0 %v2546_v4 }
 0x251   :  { %2061 = vmatpush1.bf16.msra.mxu0 %v2547_v5 }
 0x254   :  { %1425 = vmatmul.mubr.f32.vlgmr.msra.gmra.mrb[8].mxu0 %v1002_v8 }
 0x2eb   :  { %v1355_v7 = vpop.f32.mrb[10].mxu0  ;;  %v1432_v2 = vpop.f32.mrb[16].mxu1 }
 0x2ec   :  { %v1357_v13 = vpop.f32.mrb[11].mxu0  ;;  %v2094_v14 = vadd.f32 %v1432_v2, %v1355_v7  ;;  %v1434_v9 = vpop.f32.mrb[17].mxu1 }
 0x2ed   :  { %v2095_v18 = vadd.f32 %v1434_v9, %v1357_v13 }
 0x2ee   :  { %1454 = vst [vmem:[#allocation9 + $0x10] sm:$0xff] %v2094_v14 }
 0x2ef   :  { %1455 = vst [vmem:[#allocation9 + $0x18] sm:$0xff] %v2095_v18 }
 0x327   :  { %v1426_v19 = vpop.f32.mrb[8].mxu0 }
 0x328   :  { %1452 = vst [vmem:[#allocation9] sm:$0xff] %v1426_v19  ;;  %v1428_v25 = vpop.f32.mrb[9].mxu0 }
 0x329   :  { %1453 = vst [vmem:[#allocation9 + $0x8] sm:$0xff] %v1428_v25 }
 0x32a   :  { %2239 = shalt.err (!%p2236_p0)
}
 0x32b   :  { %s2240_s27 = scalar_lea.hbm %s2541_s3, 512 }
 0x32c   :  { %p2241_p1 = scmp.ne.s32.totalorder %s2541_s3, %s2240_s27  ;;  %p2244_p2 = scmp.lt.u32.totalorder %s2240_s27, %s2541_s3 }
 0x32e   :  { %p2246_p3 = pnand %p2244_p2, %p2241_p1 }
 0x330   :  { %2249 = shalt.err (!%p2246_p3)
}
 0x331   :  { %1467 = dma.vmem_to_hbm [thread:$0]  %s1462_s23, 512, %s2541_s3, [#allocation5], %s2260_s1, %s2260_s1, %s2261_s9  }
 0x332   :  { %2254 = dma.done.wait [#allocation5], 512  }
 0x333   :  { %2255 = vsyncadd [#allocation5], 4294966784 }
 0x334   :  { %1471 = vsyncpa [#allocation4], 1 }
 0x335   :  { %1472 = vsyncpa [#allocation7], 1 }
 0x336   :  { %1473 = vsyncpa [#allocation5], 1 }

</bundles_post_ra>
